<compile_context>
chip_gen: v7x
topology: tpu7x:2x2x1
jax: 0.10.0
libtpu: 0.0.40
codegen_flags: <defaults>
</compile_context>

<pallas_src>
import functools
import math

import jax
import jax.numpy as jnp
from jax.experimental import pallas as pl
from jax.experimental.pallas import tpu as pltpu


def _round_up(x, m):
    return (x + m - 1) // m * m


def conform_conv_kernel(xa_ref, xb_ref, w1_ref, b1_ref, wd_ref, bd_ref,
                        w2_ref, b2_ref, o_ref, y_ref,
                        *, kernel_size, tile_t, halo, t_real, chunk, pw1_block):
    """Grid step (b, t): one (tile_t, Cp) output tile for batch b.

    xa_ref : (1, tile_t, Cp) bf16   main x tile (rows [t*tile_t, (t+1)*tile_t) of padded x)
    xb_ref : (1, halo,   Cp) bf16   right-halo rows (first `halo` rows of the next tile)
    y_ref  : (tile_t + halo, Cp) f32 scratch -- GLU(PW1(x)) over tile + halo
    """
    K = kernel_size
    pad = (K - 1) // 2
    tT = tile_t
    Cp = y_ref.shape[-1]
    t_idx = pl.program_id(1)

    # Boundary predicate: does this tile's (tile + halo) window touch the left 'same'
    # padding (t==0) or rows past the real sequence length?  Interior tiles skip the
    # iota/validity mask entirely.
    needs_mask = jnp.logical_or(t_idx == 0,
                                (t_idx + 1) * tT + halo - pad > t_real)

    b1 = b1_ref[...]                                    # (1, 2*Cp) f32

    def pw1_glu(x_blk):
        # Single fused PW1 matmul (N = 2*Cp) -> split at the lane-aligned Cp boundary.
        h = jnp.dot(x_blk, w1_ref[...], preferred_element_type=jnp.float32) + b1
        out, gate = h[:, :Cp], h[:, Cp:]
        return out * jax.nn.sigmoid(gate)               # f32

    def store_y(y_blk, row_offset, rows):
        @pl.when(jnp.logical_not(needs_mask))
        def _():
            y_ref[pl.ds(row_offset, rows), :] = y_blk

        @pl.when(needs_mask)
        def _():
            # Zero rows outside the real [0, T) range: implements the depthwise conv's
            # 'same' zero padding and neutralizes the host-side tile padding.
            j = jax.lax.broadcasted_iota(jnp.int32, y_blk.shape, 0) + row_offset
            orig_t = t_idx * tT + j - pad
            valid = jnp.logical_and(orig_t >= 0, orig_t < t_real)
            y_ref[pl.ds(row_offset, rows), :] = jnp.where(valid, y_blk, 0.0)

    # ---- pointwise_conv1 (1x1 conv == matmul) + GLU over the tile + halo window ----
    n_pw1 = tT // pw1_block

    def pw1_body(i, carry):
        base = pl.multiple_of(i * pw1_block, pw1_block)
        store_y(pw1_glu(xa_ref[0, pl.ds(base, pw1_block), :]), base, pw1_block)
        return carry

    jax.lax.fori_loop(0, n_pw1, pw1_body, 0)
    store_y(pw1_glu(xb_ref[0]), tT, halo)               # right-halo rows

    # ---- depthwise conv (BatchNorm folded into wd/bd) + SiLU + pointwise_conv2 ----
    # Chunked over time: each chunk's f32 accumulator stays register-resident, and the
    # PW2 matmul for the chunk is issued immediately so the MXU overlaps the VALU-bound
    # depthwise work of subsequent chunks.
    wd = wd_ref[...]                                    # (K, Cp) f32, loaded once
    bd = bd_ref[...]                                    # (1, Cp) f32
    b2 = b2_ref[...]                                    # (1, Cp) f32
    n_chunks = tT // chunk

    def dw_body(c, carry):
        base = pl.multiple_of(c * chunk, chunk)
        acc = y_ref[pl.ds(base, chunk), :] * wd[0:1, :]
        for k in range(1, K):                           # K-tap loop stays unrolled
            acc = acc + y_ref[pl.ds(base + k, chunk), :] * wd[k:k + 1, :]
        acc = acc + bd
        z = (acc * jax.nn.sigmoid(acc)).astype(jnp.bfloat16)   # SiLU, bf16 for the MXU
        o = jnp.dot(z, w2_ref[...], preferred_element_type=jnp.float32) + b2
        o_ref[0, pl.ds(base, chunk), :] = o.astype(o_ref.dtype)
        return carry

    jax.lax.fori_loop(0, n_chunks, dw_body, 0)


def prepare_kernel_params(p, c_pad, eps=1e-5):
    """Fold BatchNorm into the depthwise conv, fuse the two GLU halves of PW1 into a
    single (Cp, 2*Cp) RHS, pad every channel dim to a lane-dense multiple of 128, and
    cast matmul weights to bf16."""
    C = p["pw2_b"].shape[0]
    pc = c_pad - C

    w1 = p["pw1_w"].T                          # (C, 2C): cols [0:C]=out, [C:2C]=gate
    w1a, w1b = w1[:, :C], w1[:, C:]
    b1a, b1b = p["pw1_b"][:C], p["pw1_b"][C:]

    scale = p["gamma"] / jnp.sqrt(p["var"] + eps)       # BatchNorm1d (eval) fold
    shift = p["beta"] - p["mean"] * scale
    wd = p["dw_w"].T * scale[None, :]                   # (K, C) depthwise weight * bn_scale
    bd = p["dw_b"] * scale + shift                      # (C,)

    pad_mat = lambda m: jnp.pad(m, ((0, pc), (0, pc)))
    pad_row = lambda v: jnp.pad(v, ((0, pc),)).reshape(1, c_pad).astype(jnp.float32)

    w1_fused = jnp.concatenate([pad_mat(w1a), pad_mat(w1b)], axis=1)     # (Cp, 2Cp)
    b1_fused = jnp.concatenate([pad_row(b1a), pad_row(b1b)], axis=1)     # (1, 2Cp)

    return dict(
        w1=w1_fused.astype(jnp.bfloat16),
        b1=b1_fused,
        wd=jnp.pad(wd, ((0, 0), (0, pc))).astype(jnp.float32),
        bd=pad_row(bd),
        w2=pad_mat(p["pw2_w"].T).astype(jnp.bfloat16),
        b2=pad_row(p["pw2_b"]),
    )


def conform_conv_forward(x, params, kernel_size=31, max_tile_t=512):
    """x: (B, T, C) float32 -> (B, T, C) float32 (eval-mode Conformer conv block)."""
    B, T, C = x.shape
    K = kernel_size
    assert (K - 1) % 2 == 0, "depthwise 'same' padding requires odd kernel_size"
    pad = (K - 1) // 2

    Cp = _round_up(max(C, 128), 128)                 # lane-dense channel dim
    HALO = max(32, _round_up(2 * pad, 32))           # right-halo rows (>= K-1)
    # Depthwise accumulation chunk: keep the f32 accumulator <= ~16 vregs.
    CH = max(32, min(64, ((16384 // Cp) // 32) * 32))
    align = (HALO * CH) // math.gcd(HALO, CH)

    tT = min(max_tile_t, _round_up(T, align))        # time tile
    tT = _round_up(max(tT, align), align)
    if B == 1:
        # v7x has 2 TensorCores: prefer an even parallel grid when the batch is 1.
        nT0 = _round_up(T, tT) // tT
        if nT0 % 2 == 1 and tT % (2 * align) == 0:
            tT_half = tT // 2
            if (_round_up(T, tT_half) // tT_half) % 2 == 0:
                tT = tT_half

    # PW1 row block: bounded intermediate size, divides the tile.
    PW1B = 32
    for cand in (256, 128, 64, 32):
        if tT % cand == 0 and cand * 2 * Cp * 4 <= 512 * 1024:
            PW1B = cand
            break

    Tp = _round_up(T, tT)
    nT = Tp // tT
    Ttot = Tp + tT                                   # room for left pad + last right halo

    kp = prepare_kernel_params(params, Cp)

    # Host layout: `pad` zero rows on the left, zero channel pad to Cp, zero tail so
    # every (tile, halo) block read is in bounds; single fused cast+pad pass, bf16 for
    # the MXU.
    x_host = jnp.pad(x.astype(jnp.bfloat16),
                     ((0, 0), (pad, Ttot - T - pad), (0, Cp - C)))

    kernel = functools.partial(conform_conv_kernel, kernel_size=K, tile_t=tT,
                               halo=HALO, t_real=T, chunk=CH, pw1_block=PW1B)
    const = lambda shape: pl.BlockSpec(shape, lambda b, t: (0, 0))

    # VMEM budget derived from actual block/scratch sizes (double buffers included).
    est_vmem = (
        2 * tT * Cp * 2          # x main tile (bf16)
        + 2 * HALO * Cp * 2      # x halo tile (bf16)
        + 2 * Cp * (2 * Cp) * 2  # w1 (bf16)
        + 2 * (2 * Cp) * 4       # b1
        + 2 * K * Cp * 4         # wd
        + 2 * Cp * 4             # bd
        + 2 * Cp * Cp * 2        # w2 (bf16)
        + 2 * Cp * 4             # b2
        + 2 * tT * Cp * 4        # output tile (f32)
        + (tT + HALO) * Cp * 4   # y scratch (f32)
    )
    vmem_limit = min(2 * est_vmem + (4 << 20), 48 << 20)

    out = pl.pallas_call(
        kernel,
        out_shape=jax.ShapeDtypeStruct((B, Tp, Cp), jnp.float32),
        grid_spec=pltpu.PrefetchScalarGridSpec(
            num_scalar_prefetch=0,
            grid=(B, nT),
            in_specs=[
                pl.BlockSpec((1, tT, Cp), lambda b, t: (b, t, 0)),          # x main tile
                pl.BlockSpec((1, HALO, Cp),
                             lambda b, t: (b, (t + 1) * (tT // HALO), 0)),  # x right halo
                # Weights/biases: constant index_map -> DMA'd once, not per grid step.
                const((Cp, 2 * Cp)),   # w1 (PW1, fused out|gate halves)
                const((1, 2 * Cp)),    # b1
                const((K, Cp)),        # depthwise weight (BN folded)
                const((1, Cp)),        # depthwise bias (BN folded)
                const((Cp, Cp)),       # w2 (PW2)
                const((1, Cp)),        # b2
            ],
            out_specs=pl.BlockSpec((1, tT, Cp), lambda b, t: (b, t, 0)),
            scratch_shapes=[
                pltpu.VMEM((tT + HALO, Cp), jnp.float32),   # y = GLU(PW1(x)) window
            ],
        ),
        compiler_params=pltpu.CompilerParams(
            dimension_semantics=("parallel", "parallel"),
            vmem_limit_bytes=vmem_limit,
        ),
    )(x_host, x_host, kp["w1"], kp["b1"], kp["wd"], kp["bd"], kp["w2"], kp["b2"])

    if Tp != T or Cp != C:
        out = out[:, :T, :C]
    return out


def init_params(key, channels, kernel_size):
    """Deterministic synthetic parameters in the PyTorch module's native shapes."""
    C, K = channels, kernel_size
    ks = jax.random.split(key, 10)
    s = 0.1
    return dict(
        pw1_w=s * jax.random.normal(ks[0], (2 * C, C), jnp.float32),   # Conv1d(C,2C,1).weight
        pw1_b=s * jax.random.normal(ks[1], (2 * C,), jnp.float32),
        dw_w=s * jax.random.normal(ks[2], (C, K), jnp.float32),        # depthwise (C,1,K)
        dw_b=s * jax.random.normal(ks[3], (C,), jnp.float32),
        gamma=1.0 + 0.1 * jax.random.normal(ks[4], (C,), jnp.float32), # BatchNorm1d (eval)
        beta=0.1 * jax.random.normal(ks[5], (C,), jnp.float32),
        mean=0.1 * jax.random.normal(ks[6], (C,), jnp.float32),
        var=0.5 + jnp.abs(jax.random.normal(ks[7], (C,), jnp.float32)),
        pw2_w=s * jax.random.normal(ks[8], (C, C), jnp.float32),       # Conv1d(C,C,1).weight
        pw2_b=s * jax.random.normal(ks[9], (C,), jnp.float32),
    )


def reference_forward(x, p, kernel_size, matmul_dtype=None, eps=1e-5):
    """Pure-JAX reference of the PyTorch eval-mode forward.

    matmul_dtype=None     -> faithful f32 math.
    matmul_dtype=bfloat16 -> mirrors the kernel (bf16 matmul operands, f32 accumulation,
                             f32 GLU / depthwise / BN / SiLU intermediates).
    """
    B, T, C = x.shape
    K = kernel_size
    pad = (K - 1) // 2
    cast = (lambda a: a.astype(matmul_dtype)) if matmul_dtype is not None else (lambda a: a)

    h = jnp.einsum("btc,oc->bto", cast(x), cast(p["pw1_w"]),
                   preferred_element_type=jnp.float32) + p["pw1_b"]
    out, gate = h[..., :C], h[..., C:]
    y = out * jax.nn.sigmoid(gate)                       # f32 (kernel keeps y in f32)
    yp = jnp.pad(y, ((0, 0), (pad, pad), (0, 0)))
    dw = yp[:, 0:T, :] * p["dw_w"][:, 0][None, None, :]
    for k in range(1, K):
        dw = dw + yp[:, k:k + T, :] * p["dw_w"][:, k][None, None, :]
    dw = dw + p["dw_b"]
    scale = p["gamma"] / jnp.sqrt(p["var"] + eps)
    shift = p["beta"] - p["mean"] * scale
    z = dw * scale + shift
    z = z * jax.nn.sigmoid(z)
    return jnp.einsum("btc,oc->bto", cast(z), cast(p["pw2_w"]),
                      preferred_element_type=jnp.float32) + p["pw2_b"]


if __name__ == "__main__":
    kernel_size = 31
    key = jax.random.PRNGKey(0)

    # ---- Test 1: small shapes (single time tile). ----
    B, T, C = 2, 16, 32
    kx, kparam, key = jax.random.split(key, 3)
    x = jax.random.normal(kx, (B, T, C), jnp.float32)
    params = init_params(kparam, C, kernel_size)

    out = jax.block_until_ready(conform_conv_forward(x, params, kernel_size=kernel_size))
    assert out.shape == (B, T, C)
    ref_mx = reference_forward(x, params, kernel_size, matmul_dtype=jnp.bfloat16)
    assert jnp.allclose(out, ref_mx, atol=5e-3, rtol=5e-3), \
        f"test1 max err vs bf16-mirrored ref: {jnp.max(jnp.abs(out - ref_mx))}"
    ref_f32 = reference_forward(x, params, kernel_size)
    assert jnp.allclose(out, ref_f32, atol=3e-2, rtol=3e-2), \
        f"test1 max err vs f32 ref: {jnp.max(jnp.abs(out - ref_f32))}"

    # ---- Test 2: multi-tile time axis (exercises the halo fetch, interior unmasked
    #      tiles, and last-tile masking). ----
    B2, T2, C2 = 1, 300, 64
    kx2, kparam2 = jax.random.split(key)
    x2 = jax.random.normal(kx2, (B2, T2, C2), jnp.float32)
    params2 = init_params(kparam2, C2, kernel_size)

    out2 = jax.block_until_ready(
        conform_conv_forward(x2, params2, kernel_size=kernel_size, max_tile_t=128))
    assert out2.shape == (B2, T2, C2)
    ref2 = reference_forward(x2, params2, kernel_size, matmul_dtype=jnp.bfloat16)
    assert jnp.allclose(out2, ref2, atol=5e-3, rtol=5e-3), \
        f"test2 max err vs bf16-mirrored ref: {jnp.max(jnp.abs(out2 - ref2))}"

    print("KERNEL_OK")
</pallas_src>

<mosaic_0001>
module attributes {stable_mosaic.version = 11 : i64} {
  func.func @conform_conv_kernel(%arg0: i32, %arg1: i32, %arg2: memref<1x64x128xbf16, #tpu.memory_space<vmem>>, %arg3: memref<1x32x128xbf16, #tpu.memory_space<vmem>>, %arg4: memref<128x256xbf16, #tpu.memory_space<vmem>>, %arg5: memref<1x256xf32, #tpu.memory_space<vmem>>, %arg6: memref<31x128xf32, #tpu.memory_space<vmem>>, %arg7: memref<1x128xf32, #tpu.memory_space<vmem>>, %arg8: memref<128x128xbf16, #tpu.memory_space<vmem>>, %arg9: memref<1x128xf32, #tpu.memory_space<vmem>>, %arg10: memref<1x64x128xf32, #tpu.memory_space<vmem>>, %arg11: memref<96x128xf32, #tpu.memory_space<vmem>>) attributes {dimension_semantics = [#tpu.dimension_semantics<parallel>, #tpu.dimension_semantics<parallel>], iteration_bounds = array<i64: 2, 1>, scalar_prefetch = 0 : i64, scratch_operands = 1 : i64, tpu.core_type = #tpu.core_type<tc>, window_params = [{transform_indices = @transform_0, window_bounds = array<i64: 1, 64, 128>}, {transform_indices = @transform_1, window_bounds = array<i64: 1, 32, 128>}, {pipeline_mode = #tpu.pipeline_mode<synchronous>, transform_indices = @transform_2, window_bounds = array<i64: 128, 256>}, {pipeline_mode = #tpu.pipeline_mode<synchronous>, transform_indices = @transform_3, window_bounds = array<i64: 1, 256>}, {pipeline_mode = #tpu.pipeline_mode<synchronous>, transform_indices = @transform_4, window_bounds = array<i64: 31, 128>}, {pipeline_mode = #tpu.pipeline_mode<synchronous>, transform_indices = @transform_5, window_bounds = array<i64: 1, 128>}, {pipeline_mode = #tpu.pipeline_mode<synchronous>, transform_indices = @transform_6, window_bounds = array<i64: 128, 128>}, {pipeline_mode = #tpu.pipeline_mode<synchronous>, transform_indices = @transform_7, window_bounds = array<i64: 1, 128>}, {transform_indices = @transform_8, window_bounds = array<i64: 1, 64, 128>}]} {
    %c0_i32 = arith.constant 0 : i32
    %0 = arith.cmpi eq, %arg1, %c0_i32 : i32
    %c1_i32 = arith.constant 1 : i32
    %1 = arith.addi %arg1, %c1_i32 : i32
    %c64_i32 = arith.constant 64 : i32
    %2 = arith.muli %1, %c64_i32 : i32
    %c32_i32 = arith.constant 32 : i32
    %3 = arith.addi %2, %c32_i32 : i32
    %c15_i32 = arith.constant 15 : i32
    %4 = arith.subi %3, %c15_i32 : i32
    %c16_i32 = arith.constant 16 : i32
    %5 = arith.cmpi sgt, %4, %c16_i32 : i32
    %6 = arith.ori %0, %5 : i1
    %c0 = arith.constant 0 : index
    %c0_0 = arith.constant 0 : index
    %7 = vector.load %arg5[%c0, %c0_0] : memref<1x256xf32, #tpu.memory_space<vmem>>, vector<1x256xf32>
    %c0_i32_1 = arith.constant 0 : i32
    %c64_i32_2 = arith.constant 64 : i32
    %8 = arith.muli %c0_i32_1, %c64_i32_2 : i32
    %9 = tpu.assume_multiple %8, 64 : i32
    %c0_3 = arith.constant 0 : index
    %10 = arith.index_cast %9 : i32 to index
    %c0_4 = arith.constant 0 : index
    %11 = vector.load %arg2[%c0_3, %10, %c0_4] : memref<1x64x128xbf16, #tpu.memory_space<vmem>>, vector<1x64x128xbf16>
    %12 = vector.shape_cast %11 : vector<1x64x128xbf16> to vector<64x128xbf16>
    %c0_5 = arith.constant 0 : index
    %c0_6 = arith.constant 0 : index
    %13 = vector.load %arg4[%c0_5, %c0_6] : memref<128x256xbf16, #tpu.memory_space<vmem>>, vector<128x256xbf16>
    %cst = arith.constant dense<0.000000e+00> : vector<64x256xf32>
    %14 = tpu.matmul %12, %13, %cst {dimension_numbers = #tpu.dot_dimension_numbers<[1], [0], [0], [1], [0, 0, 1, 1], [], []>} : vector<64x128xbf16>, vector<128x256xbf16>, vector<64x256xf32> -> vector<64x256xf32>
    %15 = vector.broadcast %7 : vector<1x256xf32> to vector<64x256xf32>
    %16 = arith.addf %14, %15 : vector<64x256xf32>
    %17 = vector.extract_strided_slice %16 {offsets = [0, 0], sizes = [64, 128], strides = [1, 1]} : vector<64x256xf32> to vector<64x128xf32>
    %18 = vector.extract_strided_slice %16 {offsets = [0, 128], sizes = [64, 128], strides = [1, 1]} : vector<64x256xf32> to vector<64x128xf32>
    %19 = arith.negf %18 : vector<64x128xf32>
    %20 = math.exp %19 : vector<64x128xf32>
    %cst_7 = arith.constant 1.000000e+00 : f32
    %21 = vector.broadcast %cst_7 : f32 to vector<64x128xf32>
    %22 = arith.addf %21, %20 : vector<64x128xf32>
    %23 = arith.divf %21, %22 : vector<64x128xf32>
    %24 = arith.mulf %17, %23 : vector<64x128xf32>
    %true = arith.constant true
    %25 = arith.xori %6, %true : i1
    %26 = arith.extui %25 : i1 to i32
    %c0_i32_8 = arith.constant 0 : i32
    %27 = arith.cmpi ne, %26, %c0_i32_8 : i32
    scf.if %27 {
      %286 = arith.index_cast %9 : i32 to index
      %c0_70 = arith.constant 0 : index
      %287 = vector.load %arg11[%286, %c0_70] : memref<96x128xf32, #tpu.memory_space<vmem>>, vector<64x128xf32>
      tpu.vector_store %arg11[%286, %c0_70], %24 {strides = array<i32>} : memref<96x128xf32, #tpu.memory_space<vmem>>, vector<64x128xf32>,
    } else {
    }
    %28 = arith.extui %6 : i1 to i32
    %c0_i32_9 = arith.constant 0 : i32
    %29 = arith.cmpi ne, %28, %c0_i32_9 : i32
    scf.if %29 {
      %286 = tpu.iota {dimensions = array<i32: 0>} : vector<64x128xi32>
      %287 = vector.broadcast %9 : i32 to vector<64x128xi32>
      %288 = arith.addi %286, %287 : vector<64x128xi32>
      %c64_i32_70 = arith.constant 64 : i32
      %289 = arith.muli %arg1, %c64_i32_70 : i32
      %290 = vector.broadcast %289 : i32 to vector<64x128xi32>
      %291 = arith.addi %290, %288 : vector<64x128xi32>
      %c15_i32_71 = arith.constant 15 : i32
      %292 = vector.broadcast %c15_i32_71 : i32 to vector<64x128xi32>
      %293 = arith.subi %291, %292 : vector<64x128xi32>
      %c0_i32_72 = arith.constant 0 : i32
      %294 = vector.broadcast %c0_i32_72 : i32 to vector<64x128xi32>
      %295 = arith.cmpi sge, %293, %294 : vector<64x128xi32>
      %c16_i32_73 = arith.constant 16 : i32
      %296 = vector.broadcast %c16_i32_73 : i32 to vector<64x128xi32>
      %297 = arith.cmpi slt, %293, %296 : vector<64x128xi32>
      %298 = arith.andi %295, %297 : vector<64x128xi1>
      %cst_74 = arith.constant 0.000000e+00 : f32
      %299 = vector.broadcast %cst_74 : f32 to vector<64x128xf32>
      %300 = arith.select %298, %24, %299 : vector<64x128xi1>, vector<64x128xf32>
      %301 = arith.index_cast %9 : i32 to index
      %c0_75 = arith.constant 0 : index
      %302 = vector.load %arg11[%301, %c0_75] : memref<96x128xf32, #tpu.memory_space<vmem>>, vector<64x128xf32>
      tpu.vector_store %arg11[%301, %c0_75], %300 {strides = array<i32>} : memref<96x128xf32, #tpu.memory_space<vmem>>, vector<64x128xf32>,
    } else {
    }
    %c1_i32_10 = arith.constant 1 : i32
    %c0_11 = arith.constant 0 : index
    %c0_12 = arith.constant 0 : index
    %c0_13 = arith.constant 0 : index
    %30 = vector.load %arg3[%c0_11, %c0_12, %c0_13] : memref<1x32x128xbf16, #tpu.memory_space<vmem>>, vector<1x32x128xbf16>
    %31 = vector.shape_cast %30 : vector<1x32x128xbf16> to vector<32x128xbf16>
    %c0_14 = arith.constant 0 : index
    %c0_15 = arith.constant 0 : index
    %32 = vector.load %arg4[%c0_14, %c0_15] : memref<128x256xbf16, #tpu.memory_space<vmem>>, vector<128x256xbf16>
    %cst_16 = arith.constant dense<0.000000e+00> : vector<32x256xf32>
    %33 = tpu.matmul %31, %32, %cst_16 {dimension_numbers = #tpu.dot_dimension_numbers<[1], [0], [0], [1], [0, 0, 1, 1], [], []>} : vector<32x128xbf16>, vector<128x256xbf16>, vector<32x256xf32> -> vector<32x256xf32>
    %34 = vector.broadcast %7 : vector<1x256xf32> to vector<32x256xf32>
    %35 = arith.addf %33, %34 : vector<32x256xf32>
    %36 = vector.extract_strided_slice %35 {offsets = [0, 0], sizes = [32, 128], strides = [1, 1]} : vector<32x256xf32> to vector<32x128xf32>
    %37 = vector.extract_strided_slice %35 {offsets = [0, 128], sizes = [32, 128], strides = [1, 1]} : vector<32x256xf32> to vector<32x128xf32>
    %38 = arith.negf %37 : vector<32x128xf32>
    %39 = math.exp %38 : vector<32x128xf32>
    %cst_17 = arith.constant 1.000000e+00 : f32
    %40 = vector.broadcast %cst_17 : f32 to vector<32x128xf32>
    %41 = arith.addf %40, %39 : vector<32x128xf32>
    %42 = arith.divf %40, %41 : vector<32x128xf32>
    %43 = arith.mulf %36, %42 : vector<32x128xf32>
    %true_18 = arith.constant true
    %44 = arith.xori %6, %true_18 : i1
    %45 = arith.extui %44 : i1 to i32
    %c0_i32_19 = arith.constant 0 : i32
    %46 = arith.cmpi ne, %45, %c0_i32_19 : i32
    scf.if %46 {
      %c64 = arith.constant 64 : index
      %c0_70 = arith.constant 0 : index
      %286 = vector.load %arg11[%c64, %c0_70] : memref<96x128xf32, #tpu.memory_space<vmem>>, vector<32x128xf32>
      tpu.vector_store %arg11[%c64, %c0_70], %43 {strides = array<i32>} : memref<96x128xf32, #tpu.memory_space<vmem>>, vector<32x128xf32>,
    } else {
    }
    %47 = arith.extui %6 : i1 to i32
    %c0_i32_20 = arith.constant 0 : i32
    %48 = arith.cmpi ne, %47, %c0_i32_20 : i32
    scf.if %48 {
      %286 = tpu.iota {dimensions = array<i32: 0>} : vector<32x128xi32>
      %c64_i32_70 = arith.constant 64 : i32
      %287 = vector.broadcast %c64_i32_70 : i32 to vector<32x128xi32>
      %288 = arith.addi %286, %287 : vector<32x128xi32>
      %c64_i32_71 = arith.constant 64 : i32
      %289 = arith.muli %arg1, %c64_i32_71 : i32
      %290 = vector.broadcast %289 : i32 to vector<32x128xi32>
      %291 = arith.addi %290, %288 : vector<32x128xi32>
      %c15_i32_72 = arith.constant 15 : i32
      %292 = vector.broadcast %c15_i32_72 : i32 to vector<32x128xi32>
      %293 = arith.subi %291, %292 : vector<32x128xi32>
      %c0_i32_73 = arith.constant 0 : i32
      %294 = vector.broadcast %c0_i32_73 : i32 to vector<32x128xi32>
      %295 = arith.cmpi sge, %293, %294 : vector<32x128xi32>
      %c16_i32_74 = arith.constant 16 : i32
      %296 = vector.broadcast %c16_i32_74 : i32 to vector<32x128xi32>
      %297 = arith.cmpi slt, %293, %296 : vector<32x128xi32>
      %298 = arith.andi %295, %297 : vector<32x128xi1>
      %cst_75 = arith.constant 0.000000e+00 : f32
      %299 = vector.broadcast %cst_75 : f32 to vector<32x128xf32>
      %300 = arith.select %298, %43, %299 : vector<32x128xi1>, vector<32x128xf32>
      %c64 = arith.constant 64 : index
      %c0_76 = arith.constant 0 : index
      %301 = vector.load %arg11[%c64, %c0_76] : memref<96x128xf32, #tpu.memory_space<vmem>>, vector<32x128xf32>
      tpu.vector_store %arg11[%c64, %c0_76], %300 {strides = array<i32>} : memref<96x128xf32, #tpu.memory_space<vmem>>, vector<32x128xf32>,
    } else {
    }
    %c0_21 = arith.constant 0 : index
    %c0_22 = arith.constant 0 : index
    %49 = vector.load %arg6[%c0_21, %c0_22] : memref<31x128xf32, #tpu.memory_space<vmem>>, vector<31x128xf32>
    %c0_23 = arith.constant 0 : index
    %c0_24 = arith.constant 0 : index
    %50 = vector.load %arg7[%c0_23, %c0_24] : memref<1x128xf32, #tpu.memory_space<vmem>>, vector<1x128xf32>
    %c0_25 = arith.constant 0 : index
    %c0_26 = arith.constant 0 : index
    %51 = vector.load %arg9[%c0_25, %c0_26] : memref<1x128xf32, #tpu.memory_space<vmem>>, vector<1x128xf32>
    %c0_i32_27 = arith.constant 0 : i32
    %c64_i32_28 = arith.constant 64 : i32
    %52 = arith.muli %c0_i32_27, %c64_i32_28 : i32
    %53 = tpu.assume_multiple %52, 64 : i32
    %54 = arith.index_cast %53 : i32 to index
    %c0_29 = arith.constant 0 : index
    %55 = vector.load %arg11[%54, %c0_29] : memref<96x128xf32, #tpu.memory_space<vmem>>, vector<64x128xf32>
    %56 = vector.extract_strided_slice %49 {offsets = [0, 0], sizes = [1, 128], strides = [1, 1]} : vector<31x128xf32> to vector<1x128xf32>
    %57 = vector.broadcast %56 : vector<1x128xf32> to vector<64x128xf32>
    %58 = arith.mulf %55, %57 : vector<64x128xf32>
    %c1_i32_30 = arith.constant 1 : i32
    %59 = arith.addi %53, %c1_i32_30 : i32
    %60 = arith.index_cast %59 : i32 to index
    %c0_31 = arith.constant 0 : index
    %61 = vector.load %arg11[%60, %c0_31] : memref<96x128xf32, #tpu.memory_space<vmem>>, vector<64x128xf32>
    %62 = vector.extract_strided_slice %49 {offsets = [1, 0], sizes = [1, 128], strides = [1, 1]} : vector<31x128xf32> to vector<1x128xf32>
    %63 = vector.broadcast %62 : vector<1x128xf32> to vector<64x128xf32>
    %64 = arith.mulf %61, %63 : vector<64x128xf32>
    %65 = arith.addf %58, %64 : vector<64x128xf32>
    %c2_i32 = arith.constant 2 : i32
    %66 = arith.addi %53, %c2_i32 : i32
    %67 = arith.index_cast %66 : i32 to index
    %c0_32 = arith.constant 0 : index
    %68 = vector.load %arg11[%67, %c0_32] : memref<96x128xf32, #tpu.memory_space<vmem>>, vector<64x128xf32>
    %69 = vector.extract_strided_slice %49 {offsets = [2, 0], sizes = [1, 128], strides = [1, 1]} : vector<31x128xf32> to vector<1x128xf32>
    %70 = vector.broadcast %69 : vector<1x128xf32> to vector<64x128xf32>
    %71 = arith.mulf %68, %70 : vector<64x128xf32>
    %72 = arith.addf %65, %71 : vector<64x128xf32>
    %c3_i32 = arith.constant 3 : i32
    %73 = arith.addi %53, %c3_i32 : i32
    %74 = arith.index_cast %73 : i32 to index
    %c0_33 = arith.constant 0 : index
    %75 = vector.load %arg11[%74, %c0_33] : memref<96x128xf32, #tpu.memory_space<vmem>>, vector<64x128xf32>
    %76 = vector.extract_strided_slice %49 {offsets = [3, 0], sizes = [1, 128], strides = [1, 1]} : vector<31x128xf32> to vector<1x128xf32>
    %77 = vector.broadcast %76 : vector<1x128xf32> to vector<64x128xf32>
    %78 = arith.mulf %75, %77 : vector<64x128xf32>
    %79 = arith.addf %72, %78 : vector<64x128xf32>
    %c4_i32 = arith.constant 4 : i32
    %80 = arith.addi %53, %c4_i32 : i32
    %81 = arith.index_cast %80 : i32 to index
    %c0_34 = arith.constant 0 : index
    %82 = vector.load %arg11[%81, %c0_34] : memref<96x128xf32, #tpu.memory_space<vmem>>, vector<64x128xf32>
    %83 = vector.extract_strided_slice %49 {offsets = [4, 0], sizes = [1, 128], strides = [1, 1]} : vector<31x128xf32> to vector<1x128xf32>
    %84 = vector.broadcast %83 : vector<1x128xf32> to vector<64x128xf32>
    %85 = arith.mulf %82, %84 : vector<64x128xf32>
    %86 = arith.addf %79, %85 : vector<64x128xf32>
    %c5_i32 = arith.constant 5 : i32
    %87 = arith.addi %53, %c5_i32 : i32
    %88 = arith.index_cast %87 : i32 to index
    %c0_35 = arith.constant 0 : index
    %89 = vector.load %arg11[%88, %c0_35] : memref<96x128xf32, #tpu.memory_space<vmem>>, vector<64x128xf32>
    %90 = vector.extract_strided_slice %49 {offsets = [5, 0], sizes = [1, 128], strides = [1, 1]} : vector<31x128xf32> to vector<1x128xf32>
    %91 = vector.broadcast %90 : vector<1x128xf32> to vector<64x128xf32>
    %92 = arith.mulf %89, %91 : vector<64x128xf32>
    %93 = arith.addf %86, %92 : vector<64x128xf32>
    %c6_i32 = arith.constant 6 : i32
    %94 = arith.addi %53, %c6_i32 : i32
    %95 = arith.index_cast %94 : i32 to index
    %c0_36 = arith.constant 0 : index
    %96 = vector.load %arg11[%95, %c0_36] : memref<96x128xf32, #tpu.memory_space<vmem>>, vector<64x128xf32>
    %97 = vector.extract_strided_slice %49 {offsets = [6, 0], sizes = [1, 128], strides = [1, 1]} : vector<31x128xf32> to vector<1x128xf32>
    %98 = vector.broadcast %97 : vector<1x128xf32> to vector<64x128xf32>
    %99 = arith.mulf %96, %98 : vector<64x128xf32>
    %100 = arith.addf %93, %99 : vector<64x128xf32>
    %c7_i32 = arith.constant 7 : i32
    %101 = arith.addi %53, %c7_i32 : i32
    %102 = arith.index_cast %101 : i32 to index
    %c0_37 = arith.constant 0 : index
    %103 = vector.load %arg11[%102, %c0_37] : memref<96x128xf32, #tpu.memory_space<vmem>>, vector<64x128xf32>
    %104 = vector.extract_strided_slice %49 {offsets = [7, 0], sizes = [1, 128], strides = [1, 1]} : vector<31x128xf32> to vector<1x128xf32>
    %105 = vector.broadcast %104 : vector<1x128xf32> to vector<64x128xf32>
    %106 = arith.mulf %103, %105 : vector<64x128xf32>
    %107 = arith.addf %100, %106 : vector<64x128xf32>
    %c8_i32 = arith.constant 8 : i32
    %108 = arith.addi %53, %c8_i32 : i32
    %109 = arith.index_cast %108 : i32 to index
    %c0_38 = arith.constant 0 : index
    %110 = vector.load %arg11[%109, %c0_38] : memref<96x128xf32, #tpu.memory_space<vmem>>, vector<64x128xf32>
    %111 = vector.extract_strided_slice %49 {offsets = [8, 0], sizes = [1, 128], strides = [1, 1]} : vector<31x128xf32> to vector<1x128xf32>
    %112 = vector.broadcast %111 : vector<1x128xf32> to vector<64x128xf32>
    %113 = arith.mulf %110, %112 : vector<64x128xf32>
    %114 = arith.addf %107, %113 : vector<64x128xf32>
    %c9_i32 = arith.constant 9 : i32
    %115 = arith.addi %53, %c9_i32 : i32
    %116 = arith.index_cast %115 : i32 to index
    %c0_39 = arith.constant 0 : index
    %117 = vector.load %arg11[%116, %c0_39] : memref<96x128xf32, #tpu.memory_space<vmem>>, vector<64x128xf32>
    %118 = vector.extract_strided_slice %49 {offsets = [9, 0], sizes = [1, 128], strides = [1, 1]} : vector<31x128xf32> to vector<1x128xf32>
    %119 = vector.broadcast %118 : vector<1x128xf32> to vector<64x128xf32>
    %120 = arith.mulf %117, %119 : vector<64x128xf32>
    %121 = arith.addf %114, %120 : vector<64x128xf32>
    %c10_i32 = arith.constant 10 : i32
    %122 = arith.addi %53, %c10_i32 : i32
    %123 = arith.index_cast %122 : i32 to index
    %c0_40 = arith.constant 0 : index
    %124 = vector.load %arg11[%123, %c0_40] : memref<96x128xf32, #tpu.memory_space<vmem>>, vector<64x128xf32>
    %125 = vector.extract_strided_slice %49 {offsets = [10, 0], sizes = [1, 128], strides = [1, 1]} : vector<31x128xf32> to vector<1x128xf32>
    %126 = vector.broadcast %125 : vector<1x128xf32> to vector<64x128xf32>
    %127 = arith.mulf %124, %126 : vector<64x128xf32>
    %128 = arith.addf %121, %127 : vector<64x128xf32>
    %c11_i32 = arith.constant 11 : i32
    %129 = arith.addi %53, %c11_i32 : i32
    %130 = arith.index_cast %129 : i32 to index
    %c0_41 = arith.constant 0 : index
    %131 = vector.load %arg11[%130, %c0_41] : memref<96x128xf32, #tpu.memory_space<vmem>>, vector<64x128xf32>
    %132 = vector.extract_strided_slice %49 {offsets = [11, 0], sizes = [1, 128], strides = [1, 1]} : vector<31x128xf32> to vector<1x128xf32>
    %133 = vector.broadcast %132 : vector<1x128xf32> to vector<64x128xf32>
    %134 = arith.mulf %131, %133 : vector<64x128xf32>
    %135 = arith.addf %128, %134 : vector<64x128xf32>
    %c12_i32 = arith.constant 12 : i32
    %136 = arith.addi %53, %c12_i32 : i32
    %137 = arith.index_cast %136 : i32 to index
    %c0_42 = arith.constant 0 : index
    %138 = vector.load %arg11[%137, %c0_42] : memref<96x128xf32, #tpu.memory_space<vmem>>, vector<64x128xf32>
    %139 = vector.extract_strided_slice %49 {offsets = [12, 0], sizes = [1, 128], strides = [1, 1]} : vector<31x128xf32> to vector<1x128xf32>
    %140 = vector.broadcast %139 : vector<1x128xf32> to vector<64x128xf32>
    %141 = arith.mulf %138, %140 : vector<64x128xf32>
    %142 = arith.addf %135, %141 : vector<64x128xf32>
    %c13_i32 = arith.constant 13 : i32
    %143 = arith.addi %53, %c13_i32 : i32
    %144 = arith.index_cast %143 : i32 to index
    %c0_43 = arith.constant 0 : index
    %145 = vector.load %arg11[%144, %c0_43] : memref<96x128xf32, #tpu.memory_space<vmem>>, vector<64x128xf32>
    %146 = vector.extract_strided_slice %49 {offsets = [13, 0], sizes = [1, 128], strides = [1, 1]} : vector<31x128xf32> to vector<1x128xf32>
    %147 = vector.broadcast %146 : vector<1x128xf32> to vector<64x128xf32>
    %148 = arith.mulf %145, %147 : vector<64x128xf32>
    %149 = arith.addf %142, %148 : vector<64x128xf32>
    %c14_i32 = arith.constant 14 : i32
    %150 = arith.addi %53, %c14_i32 : i32
    %151 = arith.index_cast %150 : i32 to index
    %c0_44 = arith.constant 0 : index
    %152 = vector.load %arg11[%151, %c0_44] : memref<96x128xf32, #tpu.memory_space<vmem>>, vector<64x128xf32>
    %153 = vector.extract_strided_slice %49 {offsets = [14, 0], sizes = [1, 128], strides = [1, 1]} : vector<31x128xf32> to vector<1x128xf32>
    %154 = vector.broadcast %153 : vector<1x128xf32> to vector<64x128xf32>
    %155 = arith.mulf %152, %154 : vector<64x128xf32>
    %156 = arith.addf %149, %155 : vector<64x128xf32>
    %c15_i32_45 = arith.constant 15 : i32
    %157 = arith.addi %53, %c15_i32_45 : i32
    %158 = arith.index_cast %157 : i32 to index
    %c0_46 = arith.constant 0 : index
    %159 = vector.load %arg11[%158, %c0_46] : memref<96x128xf32, #tpu.memory_space<vmem>>, vector<64x128xf32>
    %160 = vector.extract_strided_slice %49 {offsets = [15, 0], sizes = [1, 128], strides = [1, 1]} : vector<31x128xf32> to vector<1x128xf32>
    %161 = vector.broadcast %160 : vector<1x128xf32> to vector<64x128xf32>
    %162 = arith.mulf %159, %161 : vector<64x128xf32>
    %163 = arith.addf %156, %162 : vector<64x128xf32>
    %c16_i32_47 = arith.constant 16 : i32
    %164 = arith.addi %53, %c16_i32_47 : i32
    %165 = arith.index_cast %164 : i32 to index
    %c0_48 = arith.constant 0 : index
    %166 = vector.load %arg11[%165, %c0_48] : memref<96x128xf32, #tpu.memory_space<vmem>>, vector<64x128xf32>
    %167 = vector.extract_strided_slice %49 {offsets = [16, 0], sizes = [1, 128], strides = [1, 1]} : vector<31x128xf32> to vector<1x128xf32>
    %168 = vector.broadcast %167 : vector<1x128xf32> to vector<64x128xf32>
    %169 = arith.mulf %166, %168 : vector<64x128xf32>
    %170 = arith.addf %163, %169 : vector<64x128xf32>
    %c17_i32 = arith.constant 17 : i32
    %171 = arith.addi %53, %c17_i32 : i32
    %172 = arith.index_cast %171 : i32 to index
    %c0_49 = arith.constant 0 : index
    %173 = vector.load %arg11[%172, %c0_49] : memref<96x128xf32, #tpu.memory_space<vmem>>, vector<64x128xf32>
    %174 = vector.extract_strided_slice %49 {offsets = [17, 0], sizes = [1, 128], strides = [1, 1]} : vector<31x128xf32> to vector<1x128xf32>
    %175 = vector.broadcast %174 : vector<1x128xf32> to vector<64x128xf32>
    %176 = arith.mulf %173, %175 : vector<64x128xf32>
    %177 = arith.addf %170, %176 : vector<64x128xf32>
    %c18_i32 = arith.constant 18 : i32
    %178 = arith.addi %53, %c18_i32 : i32
    %179 = arith.index_cast %178 : i32 to index
    %c0_50 = arith.constant 0 : index
    %180 = vector.load %arg11[%179, %c0_50] : memref<96x128xf32, #tpu.memory_space<vmem>>, vector<64x128xf32>
    %181 = vector.extract_strided_slice %49 {offsets = [18, 0], sizes = [1, 128], strides = [1, 1]} : vector<31x128xf32> to vector<1x128xf32>
    %182 = vector.broadcast %181 : vector<1x128xf32> to vector<64x128xf32>
    %183 = arith.mulf %180, %182 : vector<64x128xf32>
    %184 = arith.addf %177, %183 : vector<64x128xf32>
    %c19_i32 = arith.constant 19 : i32
    %185 = arith.addi %53, %c19_i32 : i32
    %186 = arith.index_cast %185 : i32 to index
    %c0_51 = arith.constant 0 : index
    %187 = vector.load %arg11[%186, %c0_51] : memref<96x128xf32, #tpu.memory_space<vmem>>, vector<64x128xf32>
    %188 = vector.extract_strided_slice %49 {offsets = [19, 0], sizes = [1, 128], strides = [1, 1]} : vector<31x128xf32> to vector<1x128xf32>
    %189 = vector.broadcast %188 : vector<1x128xf32> to vector<64x128xf32>
    %190 = arith.mulf %187, %189 : vector<64x128xf32>
    %191 = arith.addf %184, %190 : vector<64x128xf32>
    %c20_i32 = arith.constant 20 : i32
    %192 = arith.addi %53, %c20_i32 : i32
    %193 = arith.index_cast %192 : i32 to index
    %c0_52 = arith.constant 0 : index
    %194 = vector.load %arg11[%193, %c0_52] : memref<96x128xf32, #tpu.memory_space<vmem>>, vector<64x128xf32>
    %195 = vector.extract_strided_slice %49 {offsets = [20, 0], sizes = [1, 128], strides = [1, 1]} : vector<31x128xf32> to vector<1x128xf32>
    %196 = vector.broadcast %195 : vector<1x128xf32> to vector<64x128xf32>
    %197 = arith.mulf %194, %196 : vector<64x128xf32>
    %198 = arith.addf %191, %197 : vector<64x128xf32>
    %c21_i32 = arith.constant 21 : i32
    %199 = arith.addi %53, %c21_i32 : i32
    %200 = arith.index_cast %199 : i32 to index
    %c0_53 = arith.constant 0 : index
    %201 = vector.load %arg11[%200, %c0_53] : memref<96x128xf32, #tpu.memory_space<vmem>>, vector<64x128xf32>
    %202 = vector.extract_strided_slice %49 {offsets = [21, 0], sizes = [1, 128], strides = [1, 1]} : vector<31x128xf32> to vector<1x128xf32>
    %203 = vector.broadcast %202 : vector<1x128xf32> to vector<64x128xf32>
    %204 = arith.mulf %201, %203 : vector<64x128xf32>
    %205 = arith.addf %198, %204 : vector<64x128xf32>
    %c22_i32 = arith.constant 22 : i32
    %206 = arith.addi %53, %c22_i32 : i32
    %207 = arith.index_cast %206 : i32 to index
    %c0_54 = arith.constant 0 : index
    %208 = vector.load %arg11[%207, %c0_54] : memref<96x128xf32, #tpu.memory_space<vmem>>, vector<64x128xf32>
    %209 = vector.extract_strided_slice %49 {offsets = [22, 0], sizes = [1, 128], strides = [1, 1]} : vector<31x128xf32> to vector<1x128xf32>
    %210 = vector.broadcast %209 : vector<1x128xf32> to vector<64x128xf32>
    %211 = arith.mulf %208, %210 : vector<64x128xf32>
    %212 = arith.addf %205, %211 : vector<64x128xf32>
    %c23_i32 = arith.constant 23 : i32
    %213 = arith.addi %53, %c23_i32 : i32
    %214 = arith.index_cast %213 : i32 to index
    %c0_55 = arith.constant 0 : index
    %215 = vector.load %arg11[%214, %c0_55] : memref<96x128xf32, #tpu.memory_space<vmem>>, vector<64x128xf32>
    %216 = vector.extract_strided_slice %49 {offsets = [23, 0], sizes = [1, 128], strides = [1, 1]} : vector<31x128xf32> to vector<1x128xf32>
    %217 = vector.broadcast %216 : vector<1x128xf32> to vector<64x128xf32>
    %218 = arith.mulf %215, %217 : vector<64x128xf32>
    %219 = arith.addf %212, %218 : vector<64x128xf32>
    %c24_i32 = arith.constant 24 : i32
    %220 = arith.addi %53, %c24_i32 : i32
    %221 = arith.index_cast %220 : i32 to index
    %c0_56 = arith.constant 0 : index
    %222 = vector.load %arg11[%221, %c0_56] : memref<96x128xf32, #tpu.memory_space<vmem>>, vector<64x128xf32>
    %223 = vector.extract_strided_slice %49 {offsets = [24, 0], sizes = [1, 128], strides = [1, 1]} : vector<31x128xf32> to vector<1x128xf32>
    %224 = vector.broadcast %223 : vector<1x128xf32> to vector<64x128xf32>
    %225 = arith.mulf %222, %224 : vector<64x128xf32>
    %226 = arith.addf %219, %225 : vector<64x128xf32>
    %c25_i32 = arith.constant 25 : i32
    %227 = arith.addi %53, %c25_i32 : i32
    %228 = arith.index_cast %227 : i32 to index
    %c0_57 = arith.constant 0 : index
    %229 = vector.load %arg11[%228, %c0_57] : memref<96x128xf32, #tpu.memory_space<vmem>>, vector<64x128xf32>
    %230 = vector.extract_strided_slice %49 {offsets = [25, 0], sizes = [1, 128], strides = [1, 1]} : vector<31x128xf32> to vector<1x128xf32>
    %231 = vector.broadcast %230 : vector<1x128xf32> to vector<64x128xf32>
    %232 = arith.mulf %229, %231 : vector<64x128xf32>
    %233 = arith.addf %226, %232 : vector<64x128xf32>
    %c26_i32 = arith.constant 26 : i32
    %234 = arith.addi %53, %c26_i32 : i32
    %235 = arith.index_cast %234 : i32 to index
    %c0_58 = arith.constant 0 : index
    %236 = vector.load %arg11[%235, %c0_58] : memref<96x128xf32, #tpu.memory_space<vmem>>, vector<64x128xf32>
    %237 = vector.extract_strided_slice %49 {offsets = [26, 0], sizes = [1, 128], strides = [1, 1]} : vector<31x128xf32> to vector<1x128xf32>
    %238 = vector.broadcast %237 : vector<1x128xf32> to vector<64x128xf32>
    %239 = arith.mulf %236, %238 : vector<64x128xf32>
    %240 = arith.addf %233, %239 : vector<64x128xf32>
    %c27_i32 = arith.constant 27 : i32
    %241 = arith.addi %53, %c27_i32 : i32
    %242 = arith.index_cast %241 : i32 to index
    %c0_59 = arith.constant 0 : index
    %243 = vector.load %arg11[%242, %c0_59] : memref<96x128xf32, #tpu.memory_space<vmem>>, vector<64x128xf32>
    %244 = vector.extract_strided_slice %49 {offsets = [27, 0], sizes = [1, 128], strides = [1, 1]} : vector<31x128xf32> to vector<1x128xf32>
    %245 = vector.broadcast %244 : vector<1x128xf32> to vector<64x128xf32>
    %246 = arith.mulf %243, %245 : vector<64x128xf32>
    %247 = arith.addf %240, %246 : vector<64x128xf32>
    %c28_i32 = arith.constant 28 : i32
    %248 = arith.addi %53, %c28_i32 : i32
    %249 = arith.index_cast %248 : i32 to index
    %c0_60 = arith.constant 0 : index
    %250 = vector.load %arg11[%249, %c0_60] : memref<96x128xf32, #tpu.memory_space<vmem>>, vector<64x128xf32>
    %251 = vector.extract_strided_slice %49 {offsets = [28, 0], sizes = [1, 128], strides = [1, 1]} : vector<31x128xf32> to vector<1x128xf32>
    %252 = vector.broadcast %251 : vector<1x128xf32> to vector<64x128xf32>
    %253 = arith.mulf %250, %252 : vector<64x128xf32>
    %254 = arith.addf %247, %253 : vector<64x128xf32>
    %c29_i32 = arith.constant 29 : i32
    %255 = arith.addi %53, %c29_i32 : i32
    %256 = arith.index_cast %255 : i32 to index
    %c0_61 = arith.constant 0 : index
    %257 = vector.load %arg11[%256, %c0_61] : memref<96x128xf32, #tpu.memory_space<vmem>>, vector<64x128xf32>
    %258 = vector.extract_strided_slice %49 {offsets = [29, 0], sizes = [1, 128], strides = [1, 1]} : vector<31x128xf32> to vector<1x128xf32>
    %259 = vector.broadcast %258 : vector<1x128xf32> to vector<64x128xf32>
    %260 = arith.mulf %257, %259 : vector<64x128xf32>
    %261 = arith.addf %254, %260 : vector<64x128xf32>
    %c30_i32 = arith.constant 30 : i32
    %262 = arith.addi %53, %c30_i32 : i32
    %263 = arith.index_cast %262 : i32 to index
    %c0_62 = arith.constant 0 : index
    %264 = vector.load %arg11[%263, %c0_62] : memref<96x128xf32, #tpu.memory_space<vmem>>, vector<64x128xf32>
    %265 = vector.extract_strided_slice %49 {offsets = [30, 0], sizes = [1, 128], strides = [1, 1]} : vector<31x128xf32> to vector<1x128xf32>
    %266 = vector.broadcast %265 : vector<1x128xf32> to vector<64x128xf32>
    %267 = arith.mulf %264, %266 : vector<64x128xf32>
    %268 = arith.addf %261, %267 : vector<64x128xf32>
    %269 = vector.broadcast %50 : vector<1x128xf32> to vector<64x128xf32>
    %270 = arith.addf %268, %269 : vector<64x128xf32>
    %271 = arith.negf %270 : vector<64x128xf32>
    %272 = math.exp %271 : vector<64x128xf32>
    %cst_63 = arith.constant 1.000000e+00 : f32
    %273 = vector.broadcast %cst_63 : f32 to vector<64x128xf32>
    %274 = arith.addf %273, %272 : vector<64x128xf32>
    %275 = arith.divf %273, %274 : vector<64x128xf32>
    %276 = arith.mulf %270, %275 : vector<64x128xf32>
    %277 = arith.truncf %276 : vector<64x128xf32> to vector<64x128xbf16>
    %c0_64 = arith.constant 0 : index
    %c0_65 = arith.constant 0 : index
    %278 = vector.load %arg8[%c0_64, %c0_65] : memref<128x128xbf16, #tpu.memory_space<vmem>>, vector<128x128xbf16>
    %cst_66 = arith.constant dense<0.000000e+00> : vector<64x128xf32>
    %279 = tpu.matmul %277, %278, %cst_66 {dimension_numbers = #tpu.dot_dimension_numbers<[1], [0], [0], [1], [0, 0, 1, 1], [], []>} : vector<64x128xbf16>, vector<128x128xbf16>, vector<64x128xf32> -> vector<64x128xf32>
    %280 = vector.broadcast %51 : vector<1x128xf32> to vector<64x128xf32>
    %281 = arith.addf %279, %280 : vector<64x128xf32>
    %c0_67 = arith.constant 0 : index
    %282 = arith.index_cast %53 : i32 to index
    %c0_68 = arith.constant 0 : index
    %283 = vector.load %arg10[%c0_67, %282, %c0_68] : memref<1x64x128xf32, #tpu.memory_space<vmem>>, vector<1x64x128xf32>
    %284 = vector.shape_cast %283 : vector<1x64x128xf32> to vector<64x128xf32>
    %285 = vector.shape_cast %281 : vector<64x128xf32> to vector<1x64x128xf32>
    tpu.vector_store %arg10[%c0_67, %282, %c0_68], %285 {strides = array<i32>} : memref<1x64x128xf32, #tpu.memory_space<vmem>>, vector<1x64x128xf32>,
    %c1_i32_69 = arith.constant 1 : i32
    return
  }
  func.func @transform_0(%arg0: i32, %arg1: i32) -> (i32, i32, i32) {
    %c0_i32 = arith.constant 0 : i32
    %c0_i32_0 = arith.constant 0 : i32
    return %arg0, %arg1, %c0_i32 : i32, i32, i32
  }
  func.func @transform_1(%arg0: i32, %arg1: i32) -> (i32, i32, i32) {
    %c1_i32 = arith.constant 1 : i32
    %0 = arith.addi %arg1, %c1_i32 : i32
    %c2_i32 = arith.constant 2 : i32
    %1 = arith.muli %0, %c2_i32 : i32
    %c0_i32 = arith.constant 0 : i32
    %c0_i32_0 = arith.constant 0 : i32
    return %arg0, %1, %c0_i32 : i32, i32, i32
  }
  func.func @transform_2(%arg0: i32, %arg1: i32) -> (i32, i32) {
    %c0_i32 = arith.constant 0 : i32
    %c0_i32_0 = arith.constant 0 : i32
    %c0_i32_1 = arith.constant 0 : i32
    return %c0_i32, %c0_i32_0 : i32, i32
  }
  func.func @transform_3(%arg0: i32, %arg1: i32) -> (i32, i32) {
    %c0_i32 = arith.constant 0 : i32
    %c0_i32_0 = arith.constant 0 : i32
    %c0_i32_1 = arith.constant 0 : i32
    return %c0_i32, %c0_i32_0 : i32, i32
  }
  func.func @transform_4(%arg0: i32, %arg1: i32) -> (i32, i32) {
    %c0_i32 = arith.constant 0 : i32
    %c0_i32_0 = arith.constant 0 : i32
    %c0_i32_1 = arith.constant 0 : i32
    return %c0_i32, %c0_i32_0 : i32, i32
  }
  func.func @transform_5(%arg0: i32, %arg1: i32) -> (i32, i32) {
    %c0_i32 = arith.constant 0 : i32
    %c0_i32_0 = arith.constant 0 : i32
    %c0_i32_1 = arith.constant 0 : i32
    return %c0_i32, %c0_i32_0 : i32, i32
  }
  func.func @transform_6(%arg0: i32, %arg1: i32) -> (i32, i32) {
    %c0_i32 = arith.constant 0 : i32
    %c0_i32_0 = arith.constant 0 : i32
    %c0_i32_1 = arith.constant 0 : i32
    return %c0_i32, %c0_i32_0 : i32, i32
  }
  func.func @transform_7(%arg0: i32, %arg1: i32) -> (i32, i32) {
    %c0_i32 = arith.constant 0 : i32
    %c0_i32_0 = arith.constant 0 : i32
    %c0_i32_1 = arith.constant 0 : i32
    return %c0_i32, %c0_i32_0 : i32, i32
  }
  func.func @transform_8(%arg0: i32, %arg1: i32) -> (i32, i32, i32) {
    %c0_i32 = arith.constant 0 : i32
    %c0_i32_0 = arith.constant 0 : i32
    return %arg0, %arg1, %c0_i32 : i32, i32, i32
  }
}

</mosaic_0001>

<bundles_post_ra>
// kernel: tpu_custom_call.1
= control target key start
LH: loop header
LB: loop body
LE: loop exit
PB: predicated region body
PF: predicated region fallthrough
CT: control target
= control target key end

     0   :  { %s4102_s0 = inlined_call_operand.hbm [shape: bf16[2,128,128], index: 0, kind: input, shape index: {}]   ;;  %s4103_s1 = inlined_call_operand.hbm [shape: bf16[2,128,128], index: 1, kind: input, shape index: {}]   ;;  %s4104_s2 = inlined_call_operand.hbm [shape: bf16[128,256], index: 2, kind: input, shape index: {}]   ;;  %s4105_s3 = inlined_call_operand.vmem [shape: f32[1,256], index: 3, kind: input, shape index: {}]   ;;  %s4106_s4 = inlined_call_operand.hbm [shape: f32[31,128], index: 4, kind: input, shape index: {}]   ;;  %s4107_s5 = inlined_call_operand.vmem [shape: f32[1,128], index: 5, kind: input, shape index: {}]   ;;  %s4108_s6 = inlined_call_operand.hbm [shape: bf16[128,128], index: 6, kind: input, shape index: {}]   ;;  %s4109_s7 = inlined_call_operand.vmem [shape: f32[1,128], index: 7, kind: input, shape index: {}]   ;;  %s4110_s8 = inlined_call_operand.hbm [shape: f32[2,64,128], index: 8, kind: output, shape index: {}]  }
   0x1   :  { %4151 = sst [smem:[#allocation37_spill]] %s4102_s0 }
   0x2   :  { %4152 = sst [smem:[#allocation38_spill]] %s4104_s2 }
   0x3   :  { %4153 = sst [smem:[#allocation39_spill]] %s4106_s4 }
   0x4   :  { %4154 = sst [smem:[#allocation40_spill]] %s4108_s6 }
   0x5   :  { %4155 = sst [smem:[#allocation41_spill]] %s4110_s8 }
   0x6   :  { %13 = vsyncpa [#allocation4], 0 }
   0x7   :  { %15 = vsyncpa [#allocation4 + $0x1], 0 }
   0x8   :  { %16 = vsyncpa [#allocation7], 0 }
   0x9   :  { %18 = vsyncpa [#allocation7 + $0x1], 0 }
   0xa   :  { %19 = vsyncpa [#allocation10], 0 }
   0xb   :  { %20 = vsyncpa [#allocation5], 0 }
   0xc   :  { %22 = vsyncpa [#allocation5 + $0x1], 0  ;;  %s3032_s27 = smov 0   ;;  %s3034_s28 = smov 0  }
   0xd   :  { %s3036_s29 = smov 0   ;;  %s3038_s30 = smov 0  }
   0xe   :  { %s3040_s9 = smov 0   ;;  %s3042_s10 = smov 0  }
   0xf LB: > { %4156 = sst [smem:[#allocation18_spill]] %s2951_s27  ;;  %s3063_s11 = sadd.s32 4294967295, %s2971_s10   ;;  %s2971_s10 = sphi %s3042_s10, %s28_s10   ;;  %s2967_s9 = sphi %s3040_s9, %s4222_s9   ;;  %s2963_s30 = sphi %s3038_s30, %s4221_s30   ;;  %s2959_s29 = sphi %s3036_s29, %s4220_s29   ;;  %s2955_s28 = sphi %s3034_s28, %s4219_s28   ;;  %s2951_s27 = sphi %s3032_s27, %s4218_s27  }
  0x10   : > { %4157 = sst [smem:[#allocation19_spill]] %s2963_s30  ;;  %s2380_s12 = sadd.s32 4294967294, %s2971_s10  }
  0x11   : > { %p62_p0 = scmp.ne.s32.totalorder %s2955_s28, %s2951_s27  ;;  %p4111_p1 = scmp.eq.s32.totalorder %s3063_s11, 0 }
  0x12   : > { %p252_p3 = scmp.eq.s32.totalorder %s2380_s12, 1  ;;  %p2381_p5 = scmp.ge.s32.totalorder %s2971_s10, 1 }
  0x13   : > { %p3072_p4 = por %p4111_p1, %p62_p0  ;;  %p259_p7 = scmp.lt.s32.totalorder %s2971_s10, 3 }
  0x14   : > { %p3077_p6 = por %p252_p3, %p62_p0  ;;  %s2973_s16 = smov [#allocation8]  }
  0x15   : > { %s4158_s13 = scalar_select %p3072_p4, 1, 0 }
  0x16   : > { %s4159_s14 = scalar_select %p3077_p6, 1, 0 }
  0x17   : > { %p3082_p8 = pnand %p2381_p5, %p259_p7  ;;  %s271_s17 = sshll.u32 %s2973_s16, 4  ;;  %s3086_s17 = int_to_ptr.vmem [resolvable:$true] %s271_s17 }
  0x18   : > { %4160 = sst [smem:[#allocation20_spill]] %s4159_s14  ;;  %s2974_s19 = smov [#allocation9]  }
  0x19   : > { %s4161_s15 = scalar_select %p3082_p8, 1, 0 }
  0x1a   : > { %p2557_p9 = pneg %p3082_p8  ;;  %s287_s20 = sshll.u32 %s2974_s19, 4  ;;  %s3097_s20 = int_to_ptr.vmem [resolvable:$true] %s287_s20 }
  0x1b   : > { %s2975_s21 = smov [#allocation11]   ;;  %s4163_s2 = sld [smem:[#allocation38_spill]] }
  0x1c   : > { %p3093_p11 = pnand %p2557_p9, %p4111_p1  ;;  %s3099_s22 = sshll.u32 %s2975_s21, 4  ;;  %s304_s22 = int_to_ptr.vmem [resolvable:$true] %s3099_s22 }
  0x1e   : > { %p3109_p13 = pneg %p3093_p11 }
  0x21   : > { %s2732_s25 = scalar_lea.hbm %s4163_s2, 2048 }
  0x22   : > { %p2733_p12 = scmp.ne.s32.totalorder %s4163_s2, %s2732_s25  ;;  %p2739_p5 = scmp.lt.u32.totalorder %s2732_s25, %s4163_s2 }
  0x24   : > { %p2735_p0 = pnand %p3109_p13, %p2733_p12 }
  0x26   : > { %p2736_p3 = pneg %p2735_p0 }
  0x28   : > { %p2741_p7 = pnand %p2739_p5, %p2736_p3 }
  0x2a   : > { %2744 = shalt.err (!%p2741_p7)
}
  0x2b   : > { %s2745_s23 = scalar_lea.vmem %s3086_s17, 2048  ;;  %p2753_p2 = scmp.lt.s32.totalorder %s3086_s17, %s3086_s17 }
  0x2c   : > { %p2746_p9 = scmp.ne.s32.totalorder %s3086_s17, %s2745_s23  ;;  %p2754_p6 = scmp.lt.s32.totalorder %s2745_s23, %s2745_s23 }
  0x2e   : > { %p2748_p10 = pnand %p2746_p9, %p3109_p13  ;;  %p2755_p12 = por %p2754_p6, %p2753_p2 }
  0x30   : > { %p2749_p1 = pneg %p2748_p10 }
  0x32   : > { %p2756_p0 = pnand %p2755_p12, %p2749_p1 }
  0x34   : > { %2759 = shalt.err (!%p2756_p0)
}
  0x35   : > { %s2976_s24 = smov 128   ;;  %s2977_s25 = smov 8  }
  0x36   : > { %2560 = dma.hbm_to_vmem [thread:$0]  (!%p3093_p11), %s4163_s2, 2048, %s3086_s17, [#allocation7], %s2976_s24, %s2976_s24, %s2977_s25  }
  0x37   : > { %s4165_s4 = sld [smem:[#allocation39_spill]] }
  0x3d   : > { %s2760_s14 = scalar_lea.hbm %s4165_s4, 512 }
  0x3e   : > { %p2761_p2 = scmp.ne.s32.totalorder %s4165_s4, %s2760_s14  ;;  %p2767_p10 = scmp.lt.u32.totalorder %s2760_s14, %s4165_s4 }
  0x40   : > { %p2763_p1 = pnand %p2761_p2, %p3109_p13 }
  0x42   : > { %p2764_p6 = pneg %p2763_p1 }
  0x44   : > { %p2769_p3 = pnand %p2767_p10, %p2764_p6 }
  0x46   : > { %2772 = shalt.err (!%p2769_p3)
}
  0x47   : > { %s2773_s17 = scalar_lea.vmem %s3097_s20, 512  ;;  %p2781_p12 = scmp.lt.s32.totalorder %s3097_s20, %s3097_s20 }
  0x48   : > { %p2774_p5 = scmp.ne.s32.totalorder %s3097_s20, %s2773_s17  ;;  %p2782_p0 = scmp.lt.s32.totalorder %s2773_s17, %s2773_s17 }
  0x4a   : > { %p2776_p7 = pnand %p2774_p5, %p3109_p13  ;;  %p2783_p2 = por %p2782_p0, %p2781_p12 }
  0x4c   : > { %p2777_p9 = pneg %p2776_p7 }
  0x4e   : > { %p2784_p1 = pnand %p2783_p2, %p2777_p9 }
  0x50   : > { %2787 = shalt.err (!%p2784_p1)
}
  0x51   : > { %2563 = dma.hbm_to_vmem [thread:$0]  (!%p3093_p11), %s4165_s4, 512, %s3097_s20, [#allocation10], %s2976_s24, %s2976_s24, %s2977_s25  }
  0x52   : > { %s4166_s6 = sld [smem:[#allocation40_spill]] }
  0x58   : > { %s2788_s26 = scalar_lea.hbm %s4166_s6, 1024 }
  0x59   : > { %p2789_p6 = scmp.ne.s32.totalorder %s4166_s6, %s2788_s26  ;;  %p2795_p5 = scmp.lt.u32.totalorder %s2788_s26, %s4166_s6 }
  0x5b   : > { %p2791_p10 = pnand %p2789_p6, %p3109_p13 }
  0x5d   : > { %p2792_p3 = pneg %p2791_p10 }
  0x5f   : > { %p2797_p7 = pnand %p2795_p5, %p2792_p3 }
  0x61   : > { %2800 = shalt.err (!%p2797_p7)
}
  0x62   : > { %s2801_s17 = scalar_lea.vmem %s304_s22, 1024  ;;  %p2809_p2 = scmp.lt.s32.totalorder %s304_s22, %s304_s22 }
  0x63   : > { %p2802_p9 = scmp.ne.s32.totalorder %s304_s22, %s2801_s17  ;;  %p2810_p1 = scmp.lt.s32.totalorder %s2801_s17, %s2801_s17 }
  0x65   : > { %p2804_p12 = pnand %p2802_p9, %p3109_p13  ;;  %p2811_p4 = por %p2810_p1, %p2809_p2 }
  0x67   : > { %p2805_p0 = pneg %p2804_p12 }
  0x69   : > { %p2812_p8 = pnand %p2811_p4, %p2805_p0 }
  0x6b   : > { %2815 = shalt.err (!%p2812_p8)
}
  0x6c   : > { %s4117_s20 = smov 64   ;;  %s4119_s16 = smov 4  }
  0x6d   : > { %2566 = dma.hbm_to_vmem [thread:$0]  (!%p3093_p11), %s4166_s6, 1024, %s304_s22, [#allocation10], %s4117_s20, %s4117_s20, %s4119_s16  }
  0x6e   : > { %s49_s8 = sadd.s32 1, %s2959_s29  ;;  %s40_s27 = sadd.s32 1, %s2967_s9 }
  0x6f   : > { %p56_p4 = scmp.ne.s32.totalorder %s2959_s29, %s2955_s28  ;;  %p42_p8 = scmp.ge.s32.totalorder %s40_s27, 2 }
  0x70   : > { %p57_p13 = scmp.eq.s32.totalorder %s2971_s10, 0  ;;  %p4167_p6 = scmp.eq.s32.totalorder %s3063_s11, 1 }
  0x71   : > { %p2581_p3 = scmp.lt.s32.totalorder %s2971_s10, 2  ;;  %s4224_s27 = smov (%p42_p8, %s40_s27), 0 }
  0x72   : > { %p3182_p10 = por %p4167_p6, %p56_p4  ;;  %p58_p5 = por %p57_p13, %p56_p4 }
  0x73   : > { %s3190_s18 = sand.u32 1, %s2959_s29   ;;  %s44_s22 = ssub.s32 %s2967_s9, %s4224_s27 }
  0x74   : > { %p47_p11 = scmp.eq.s32.totalorder %s44_s22, 0  ;;  %s2386_s14 = sshll.u32 %s3190_s18, 5 }
  0x75   : > { %s2484_s26 = sshll.u32 %s2967_s9, 10  ;;  %s4169_s0 = sld [smem:[#allocation37_spill]] }
  0x76   : > { %s3197_s12 = scalar_select %p47_p11, %s2959_s29, %s49_s8  }
  0x77   : > { %s324_s17 = scalar_lea.vmem [#allocation3], %s2386_s14  ;;  %p3208_p7 = pnand %p2581_p3, %p58_p5 }
  0x78   : > { %s333_s24 = sshll.u32 %s324_s17, 4  ;;  %s3215_s19 = scalar_lea.hbm %s4103_s1, %s2484_s26  ;;  %s3204_s24 = int_to_ptr.vmem [resolvable:$true] %s333_s24 }
  0x79   : > { %s343_s21 = sand.u32 1, %s2971_s10   ;;  %s321_s20 = scalar_lea.sflag [#allocation4], %s3190_s18 }
  0x7a   : > { %p2818_p12 = pneg %p3208_p7 }
  0x7b   : > { %s3202_s23 = scalar_lea.hbm %s4169_s0, %s2484_s26  ;;  %s2821_s2 = scalar_lea.hbm %s4169_s0, 2048 }
  0x7c   : > { %s2816_s16 = scalar_lea.hbm %s3202_s23, 512  ;;  %p2822_p1 = scmp.lt.u32.totalorder %s3202_s23, %s4169_s0 }
  0x7d   : > { %p2817_p9 = scmp.ne.s32.totalorder %s3202_s23, %s2816_s16  ;;  %p2823_p4 = scmp.lt.u32.totalorder %s2821_s2, %s2816_s16 }
  0x7e   : > { %p2825_p13 = scmp.lt.u32.totalorder %s2816_s16, %s3202_s23 }
  0x7f   : > { %p2819_p0 = pnand %p2818_p12, %p2817_p9  ;;  %p2824_p8 = por %p2823_p4, %p2822_p1 }
  0x81   : > { %p2820_p2 = pneg %p2819_p0  ;;  %p2826_p6 = por %p2825_p13, %p2824_p8 }
  0x83   : > { %p2827_p3 = pnand %p2826_p6, %p2820_p2 }
  0x85   : > { %2830 = shalt.err (!%p2827_p3)
}
  0x86   : > { %s2831_s26 = scalar_lea.vmem %s3204_s24, 512  ;;  %s2980_s22 = smov [#allocation3]  }
  0x87   : > { %p2832_p5 = scmp.ne.s32.totalorder %s3204_s24, %s2831_s26  ;;  %s2836_s14 = sshll.u32 %s2980_s22, 4  ;;  %s2837_s14 = int_to_ptr.vmem [resolvable:$false] %s2836_s14 }
  0x88   : > { %s2838_s4 = scalar_lea.vmem %s2837_s14, 1024  ;;  %p2839_p0 = scmp.lt.s32.totalorder %s3204_s24, %s2837_s14 }
  0x89   : > { %p2834_p11 = pnand %p2832_p5, %p2818_p12  ;;  %p2840_p1 = scmp.lt.s32.totalorder %s2838_s4, %s2831_s26 }
  0x8b   : > { %p2835_p9 = pneg %p2834_p11  ;;  %p2841_p4 = por %p2840_p1, %p2839_p0 }
  0x8d   : > { %p2842_p8 = pnand %p2841_p4, %p2835_p9 }
  0x8f   : > { %2845 = shalt.err (!%p2842_p8)
}
  0x90   : > { %s4171_s2 = smov 4   ;;  %s4172_s16 = smov 64  }
  0x91   : > { %2570 = dma.hbm_to_vmem [thread:$0]  (!%p3208_p7), %s3202_s23, 512, %s3204_s24, %s321_s20, %s4172_s16, %s4172_s16, %s4171_s2  }
  0x92   : > { %s3250_s17 = scalar_lea.hbm %s3215_s19, 512  ;;  %s2389_s8 = sshll.u32 %s3190_s18, 4 }
  0x93   : > { %s347_s26 = scalar_lea.vmem [#allocation6], %s2389_s8  ;;  %s3257_s14 = scalar_lea.sflag [#allocation7], %s343_s21 }
  0x94   : > { %s358_s22 = sshll.u32 %s347_s26, 4  ;;  %s2876_s4 = scalar_lea.hbm %s3215_s19, 768  ;;  %s3253_s22 = int_to_ptr.vmem [resolvable:$true] %s358_s22 }
  0x95   : > { %p2847_p2 = scmp.ne.s32.totalorder %s3250_s17, %s2876_s4  ;;  %s2851_s24 = scalar_lea.hbm %s4103_s1, 2048 }
  0x96   : > { %p2852_p3 = scmp.lt.u32.totalorder %s3250_s17, %s4103_s1  ;;  %p2853_p5 = scmp.lt.u32.totalorder %s2851_s24, %s2876_s4 }
  0x97   : > { %p2849_p13 = pnand %p2847_p2, %p2818_p12  ;;  %p2855_p9 = scmp.lt.u32.totalorder %s2876_s4, %s3250_s17 }
  0x98   : > { %p2854_p11 = por %p2853_p5, %p2852_p3 }
  0x99   : > { %p2850_p6 = pneg %p2849_p13 }
  0x9a   : > { %p2856_p0 = por %p2855_p9, %p2854_p11 }
  0x9c   : > { %p2857_p1 = pnand %p2856_p0, %p2850_p6 }
  0x9e   : > { %2860 = shalt.err (!%p2857_p1)
}
  0x9f   : > { %s2861_s18 = scalar_lea.vmem %s3253_s22, 256  ;;  %s2981_s19 = smov [#allocation6]  }
  0xa0   : > { %p2862_p4 = scmp.ne.s32.totalorder %s3253_s22, %s2861_s18  ;;  %s2866_s21 = sshll.u32 %s2981_s19, 4  ;;  %s2867_s21 = int_to_ptr.vmem [resolvable:$false] %s2866_s21 }
  0xa1   : > { %s2868_s0 = scalar_lea.vmem %s2867_s21, 512  ;;  %p2869_p13 = scmp.lt.s32.totalorder %s3253_s22, %s2867_s21 }
  0xa2   : > { %p2864_p8 = pnand %p2862_p4, %p2818_p12  ;;  %p2870_p3 = scmp.lt.s32.totalorder %s2868_s0, %s2861_s18 }
  0xa4   : > { %p2865_p2 = pneg %p2864_p8  ;;  %p2871_p5 = por %p2870_p3, %p2869_p13 }
  0xa6   : > { %p2872_p11 = pnand %p2871_p5, %p2865_p2 }
  0xa8   : > { %2875 = shalt.err (!%p2872_p11)
}
  0xa9   : > { %2573 = dma.hbm_to_vmem [thread:$0]  (!%p3208_p7), %s3250_s17, 256, %s3253_s22, %s3257_s14, %s4172_s16, %s4172_s16, %s4171_s2  }
  0xaa   : > { %p4173_p12 = scmp.ne.s32.totalorder %s4161_s15, 0 }
  0xac   : > { %370 = sbr.rel (%p4173_p12) target bundleno = 821 (0x335), region = 52 }
  0xb3   : > { %s3289_s6 = sand.u32 1, %s2955_s28   ;;  %p4174_p6 = scmp.ne.s32.totalorder %s4158_s13, 0 }
  0xb4   : > { %s2393_s8 = sshll.u32 %s3289_s6, 5  ;;  %s373_s26 = scalar_lea.sflag [#allocation4], %s3289_s6 }
  0xb5   : > { %s3293_s4 = scalar_lea.vmem [#allocation3], %s2393_s8 }
  0xb6   : > { %2930 = dma.done.wait (%p4174_p6), %s373_s26, 512  }
  0xb7   : > { %2932 = vsyncadd (%p4174_p6), %s373_s26, 4294966784  ;;  %s381_s15 = sand.u32 1, %s3063_s11   ;;  %s2394_s25 = sshll.u32 %s3289_s6, 4 }
  0xb8   : > { %s382_s2 = scalar_lea.sflag [#allocation7], %s381_s15  ;;  %s3301_s16 = scalar_lea.vmem [#allocation6], %s2394_s25 }
  0xb9   : > { %2934 = dma.done.wait (%p4174_p6), %s382_s2, 256  }
  0xba   : > { %2936 = vsyncadd (%p4174_p6), %s382_s2, 4294967040  ;;  %p4175_p7 = scmp.eq.s32.totalorder %s3063_s11, 0 }
  0xbc   : > { %2938 = dma.done.wait (%p4175_p7), [#allocation7], 2048   ;;  %p4176_p9 = pmov %p4175_p7 }
  0xbd   : > { %p4177_p0 = pmov %p4175_p7 }
  0xbe   : > { %2940 = vsyncadd (%p4176_p9), [#allocation7], 4294965248 }
  0xbf   : > { %2942 = dma.done.wait (%p4177_p0), [#allocation10], 1536   ;;  %p4178_p1 = pmov %p4177_p0 }
  0xc0   : > { %v2982_v0 = vmov 0   ;;  %v2645_v1 = vld [vmem:[#allocation8 + $0x4] ss:$8 sps:$4 sm:$0xff]   ;;  %v2647_v2 = vld [vmem:[#allocation8] ss:$8 sps:$4 sm:$0xff]   ;;  %v2983_v19 = vmov 0.0   ;;  %v473_v20 = vlaneseq }
  0xc1   : > { %2944 = vsyncadd (%p4178_p1), [#allocation10], 4294965760  ;;  %619 = vmatprep.mubr.bf16.mxu0 %v2982_v0  ;;  %950 = vmatprep.mubr.bf16.mxu1 %v2982_v0  ;;  %v2648_v3 = vld [vmem:[#allocation8 + $0x14] ss:$8 sps:$4 sm:$0xff]   ;;  %v2650_v4 = vld [vmem:[#allocation8 + $0x10] ss:$8 sps:$4 sm:$0xff]  }
  0xc2   : > { %587 = vmatprep.subr.bf16.mxu0 %v2645_v1  ;;  %918 = vmatprep.subr.bf16.mxu1 %v2645_v1  ;;  %v2651_v5 = vld [vmem:[#allocation8 + $0x24] ss:$8 sps:$4 sm:$0xff]   ;;  %v2653_v6 = vld [vmem:[#allocation8 + $0x20] ss:$8 sps:$4 sm:$0xff]   ;;  %v2654_v7 = vld [vmem:[#allocation8 + $0x34] ss:$8 sps:$4 sm:$0xff]  }
  0xc3   : > { %588 = vmatpush1.bf16.msra.mxu0 %v2647_v2  ;;  %919 = vmatpush1.bf16.msra.mxu1 %v2647_v2  ;;  %v2656_v8 = vld [vmem:[#allocation8 + $0x30] ss:$8 sps:$4 sm:$0xff]   ;;  %v2657_v9 = vld [vmem:[#allocation8 + $0x44] ss:$8 sps:$4 sm:$0xff]   ;;  %v2659_v10 = vld [vmem:[#allocation8 + $0x40] ss:$8 sps:$4 sm:$0xff]  }
  0xc4   : > { %589 = vmatprep.subr.bf16.mxu0 %v2648_v3  ;;  %920 = vmatprep.subr.bf16.mxu1 %v2648_v3  ;;  %v2660_v11 = vld [vmem:[#allocation8 + $0x54] ss:$8 sps:$4 sm:$0xff]   ;;  %v2662_v12 = vld [vmem:[#allocation8 + $0x50] ss:$8 sps:$4 sm:$0xff]   ;;  %v2663_v13 = vld [vmem:[#allocation8 + $0x64] ss:$8 sps:$4 sm:$0xff]  }
  0xc5   : > { %v2665_v14 = vld [vmem:[#allocation8 + $0x60] ss:$8 sps:$4 sm:$0xff]   ;;  %v2666_v15 = vld [vmem:[#allocation8 + $0x74] ss:$8 sps:$4 sm:$0xff]   ;;  %v2668_v16 = vld [vmem:[#allocation8 + $0x70] ss:$8 sps:$4 sm:$0xff]  }
  0xc6   : > { %v2669_v17 = vld [vmem:[%s3293_s4] sm:$0xff]   ;;  %v2670_v18 = vld [vmem:[%s3293_s4 + $0x8] sm:$0xff]   ;;  %791 = vst [vmem:[#allocation2 + $0x20] sm:$0xff] %v2983_v19  ;;  %792 = vst [vmem:[#allocation2 + $0x28] sm:$0xff] %v2983_v19  ;;  %v3321_v21 = vshrl.u32 %v473_v20, 7  ;;  %s2398_s14 = sshll.u32 %s3289_s6, 6 }
  0xc7   : > { %590 = vmatpush1.bf16.msra.mxu0 %v2650_v4  ;;  %921 = vmatpush1.bf16.msra.mxu1 %v2650_v4  ;;  %793 = vst [vmem:[#allocation2 + $0x30] sm:$0xff] %v2983_v19  ;;  %794 = vst [vmem:[#allocation2 + $0x38] sm:$0xff] %v2983_v19  ;;  %v1048_v23 = vld [vmem:[#allocation9] sm:$0xff]  ;;  %v3383_v51 = vld [vmem:[#allocation9 + $0x8] sm:$0xff]  ;;  %s4211_s24 = sld [smem:[#allocation19_spill]]  ;;  %s434_s18 = scalar_lea.vmem [#allocation12], %s2398_s14 }
  0xc8   : > { %591 = vmatprep.subr.bf16.mxu0 %v2651_v5  ;;  %922 = vmatprep.subr.bf16.mxu1 %v2651_v5  ;;  %1037 = vst [vmem:[#allocation2 + $0x40] sm:$0xff] %v2983_v19  ;;  %787 = vst [vmem:[#allocation2] sm:$0xff] %v2983_v19  ;;  %v3324_v22 = vsub.s32 1, %v3321_v21  ;;  %v3329_v26 = vsub.s32 0, %v3321_v21  ;;  %v3341_v31 = vsub.s32 2, %v3321_v21  ;;  %v3347_v33 = vsub.s32 3, %v3321_v21 }
  0xc9   : > { %1038 = vst [vmem:[#allocation2 + $0x48] sm:$0xff] %v2983_v19  ;;  %1039 = vst [vmem:[#allocation2 + $0x50] sm:$0xff] %v2983_v19  ;;  %v3350_v34 = vsub.s32 4, %v3321_v21  ;;  %v3358_v38 = vsub.s32 5, %v3321_v21  ;;  %v3373_v46 = vsub.s32 7, %v3321_v21  ;;  %v3379_v48 = vsub.s32 6, %v3321_v21 }
  0xca   : > { %1040 = vst [vmem:[#allocation2 + $0x58] sm:$0xff] %v2983_v19  ;;  %4179 = vst [vmem:[#allocation21_spill] sm:$0xff] %v3321_v21  ;;  %v3332_v27 = vrot.slane %v1048_v23, %v3324_v22  ;;  %v3335_v28 = vrot.slane %v1048_v23, %v3329_v26  ;;  %v3355_v37 = vrot.slane %v1048_v23, %v3341_v31  ;;  %s2207_s19 = sshll.u32 %s434_s18, 4  ;;  %s4212_s26 = sld [smem:[#allocation41_spill]]  ;;  %s4048_s19 = int_to_ptr.vmem [resolvable:$true] %s2207_s19 }
  0xcb   : > { %592 = vmatpush1.bf16.msra.mxu0 %v2653_v6  ;;  %923 = vmatpush1.bf16.msra.mxu1 %v2653_v6  ;;  %4180 = vst [vmem:[#allocation22_spill] sm:$0xff] %v3324_v22  ;;  %v3367_v43 = vrot.slane %v1048_v23, %v3347_v33  ;;  %v3376_v47 = vrot.slane %v1048_v23, %v3350_v34  ;;  %s2192_s15 = scalar_lea.sflag [#allocation5], %s3289_s6  ;;  %s2877_s25 = scalar_lea.vmem %s4048_s19, 1024 }
  0xcc   : > { %593 = vmatprep.subr.bf16.mxu0 %v2654_v7  ;;  %924 = vmatprep.subr.bf16.mxu1 %v2654_v7  ;;  %4181 = vst [vmem:[#allocation23_spill] sm:$0xff] %v3332_v27  ;;  %4182 = vst [vmem:[#allocation24_spill] sm:$0xff] %v3335_v28  ;;  %v3344_v32 = vmul.f32 0.0, %v3335_v28  ;;  %v3393_v58 = vrot.slane %v1048_v23, %v3358_v38  ;;  %v3405_v4 = vrot.slane %v1048_v23, %v3373_v46  ;;  %p2878_p4 = scmp.ne.s32.totalorder %s4048_s19, %s2877_s25  ;;  %s2984_s2 = smov [#allocation12]  }
  0xcd   : > { %v1080_v24 = vld [vmem:[#allocation2 + $0x21] sm:$0xff]  ;;  %4184 = vst [vmem:[#allocation26_spill] sm:$0xff] %v3355_v37  ;;  %4185 = vst [vmem:[#allocation27_spill] sm:$0xff] %v3367_v43  ;;  %v3409_v5 = vrot.slane %v3383_v51, %v3329_v26  ;;  %v3412_v6 = vrot.slane %v1048_v23, %v3379_v48  ;;  %s2486_s21 = sshll.u32 %s4211_s24, 10 }
  0xce   : > { %v3326_v25 = vld [vmem:[#allocation2 + $0x29] sm:$0xff]  ;;  %v1092_v29 = vmul.f32 %v3332_v27, %v1080_v24  ;;  %4183 = vst [vmem:[#allocation25_spill] sm:$0xff] %v3344_v32  ;;  %v3362_v41 = vld [vmem:[#allocation2 + $0x31] sm:$0xff]  ;;  %4186 = vst [vmem:[#allocation28_spill] sm:$0xff] %v3376_v47  ;;  %p2879_p8 = pnand %p2878_p4, %p3182_p10 }
  0xcf   : > { %594 = vmatpush1.bf16.msra.mxu0 %v2656_v8  ;;  %925 = vmatpush1.bf16.msra.mxu1 %v2656_v8  ;;  %v1093_v30 = vmul.f32 %v3332_v27, %v3326_v25  ;;  %v1110_v39 = vld [vmem:[#allocation2 + $0x22] sm:$0xff]  ;;  %v3360_v40 = vld [vmem:[#allocation2 + $0x2a] sm:$0xff]  ;;  %v3364_v42 = vld [vmem:[#allocation2 + $0x39] sm:$0xff]  ;;  %v1094_v56 = vmul.f32 %v3332_v27, %v3362_v41  ;;  %4187 = vst [vmem:[#allocation29_spill] sm:$0xff] %v3393_v58 }
  0xd0   : > { %595 = vmatprep.subr.bf16.mxu0 %v2657_v9  ;;  %926 = vmatprep.subr.bf16.mxu1 %v2657_v9  ;;  %v1100_v35 = vadd.f32 %v1092_v29, %v3344_v32  ;;  %v1122_v44 = vmul.f32 %v3355_v37, %v1110_v39  ;;  %v1123_v45 = vmul.f32 %v3355_v37, %v3360_v40  ;;  %v1140_v49 = vld [vmem:[#allocation2 + $0x23] sm:$0xff]  ;;  %v3381_v50 = vld [vmem:[#allocation2 + $0x2b] sm:$0xff]  ;;  %v3399_v62 = vld [vmem:[#allocation2 + $0x3a] sm:$0xff]  ;;  %p2880_p2 = pneg %p2879_p8 }
  0xd1   : > { %v1101_v36 = vadd.f32 %v1093_v30, %v3344_v32  ;;  %v1152_v54 = vmul.f32 %v3367_v43, %v1140_v49  ;;  %v1153_v55 = vmul.f32 %v3367_v43, %v3381_v50  ;;  %v1095_v57 = vmul.f32 %v3332_v27, %v3364_v42  ;;  %v1170_v59 = vld [vmem:[#allocation2 + $0x24] sm:$0xff]  ;;  %v3395_v60 = vld [vmem:[#allocation2 + $0x2c] sm:$0xff]  ;;  %4188 = vst [vmem:[#allocation30_spill] sm:$0xff] %v3405_v4 }
  0xd2   : > { %v1130_v52 = vadd.f32 %v1122_v44, %v1100_v35  ;;  %v3397_v61 = vld [vmem:[#allocation2 + $0x32] sm:$0xff]  ;;  %v1182_v2 = vmul.f32 %v3376_v47, %v1170_v59  ;;  %v1183_v3 = vmul.f32 %v3376_v47, %v3395_v60  ;;  %4189 = vst [vmem:[#allocation31_spill] sm:$0xff] %v3409_v5  ;;  %4190 = vst [vmem:[#allocation32_spill] sm:$0xff] %v3412_v6  ;;  %v1200_v7 = vld [vmem:[#allocation2 + $0x25] sm:$0xff]  ;;  %v3433_v30 = vmul.f32 0.0, %v3409_v5 }
  0xd3   : > { %596 = vmatpush1.bf16.msra.mxu0 %v2659_v10  ;;  %927 = vmatpush1.bf16.msra.mxu1 %v2659_v10  ;;  %v1131_v53 = vadd.f32 %v1123_v45, %v1101_v36  ;;  %v3414_v8 = vld [vmem:[#allocation2 + $0x2d] sm:$0xff]  ;;  %v3441_v36 = vrot.slane %v3383_v51, %v3324_v22  ;;  %v3456_v59 = vrot.slane %v3383_v51, %v3341_v31 }
  0xd4   : > { %597 = vmatprep.subr.bf16.mxu0 %v2660_v11  ;;  %928 = vmatprep.subr.bf16.mxu1 %v2660_v11  ;;  %v1160_v63 = vadd.f32 %v1152_v54, %v1130_v52  ;;  %v3416_v9 = vld [vmem:[#allocation9 + $0x10] sm:$0xff]  ;;  %v1260_v39 = vld [vmem:[#allocation2 + $0x27] sm:$0xff] }
  0xd5   : > { %v1161_v1 = vadd.f32 %v1153_v55, %v1131_v53  ;;  %v3427_v19 = vld [vmem:[#allocation2 + $0x2e] sm:$0xff]  ;;  %v3437_v35 = vrot.slane %v3416_v9, %v3329_v26  ;;  %v1272_v53 = vmul.f32 %v3405_v4, %v1260_v39  ;;  %v3452_v55 = vrot.slane %v3383_v51, %v3373_v46 }
  0xd6   : > { %v1190_v10 = vadd.f32 %v1182_v2, %v1160_v63  ;;  %v1243_v29 = vmul.f32 %v3412_v6, %v3427_v19  ;;  %v3443_v44 = vld [vmem:[#allocation2 + $0x2f] sm:$0xff]  ;;  %v2671_v63 = vld [vmem:[#allocation11] sm:$0xff]   ;;  %v3554_v28 = vrot.slane %v3416_v9, %v3358_v38 }
  0xd7   : > { %598 = vmatpush1.bf16.msra.mxu0 %v2662_v12  ;;  %929 = vmatpush1.bf16.msra.mxu1 %v2662_v12  ;;  %v1191_v11 = vadd.f32 %v1183_v3, %v1161_v1  ;;  %v1212_v12 = vmul.f32 %v3393_v58, %v1200_v7  ;;  %4191 = vst [vmem:[#allocation33_spill] sm:$0xff] %v3437_v35  ;;  %v3445_v45 = vld [vmem:[#allocation2 + $0x33] sm:$0xff]  ;;  %v2673_v2 = vld [vmem:[#allocation11 + $0x8] sm:$0xff]   ;;  %v3459_v3 = vld [vmem:[#allocation2 + $0x3b] sm:$0xff] }
  0xd8   : > { %599 = vmatprep.subr.bf16.mxu0 %v2663_v13  ;;  %930 = vmatprep.subr.bf16.mxu1 %v2663_v13  ;;  %v1213_v13 = vmul.f32 %v3393_v58, %v3414_v8  ;;  %v1273_v54 = vmul.f32 %v3405_v4, %v3443_v44  ;;  %v2672_v1 = vld [vmem:[%s3301_s16] sm:$0xff]   ;;  %v1512_v5 = vmul.f32 %v3452_v55, %v3443_v44 }
  0xd9   : > { %v1220_v20 = vadd.f32 %v1212_v12, %v1190_v10  ;;  %v2676_v7 = vld [vmem:[%s3293_s4 + $0x10] sm:$0xff]   ;;  %v1332_v12 = vmul.f32 %v3441_v36, %v3326_v25  ;;  %v3569_v44 = vrot.slane %v3416_v9, %v3373_v46  ;;  %v2678_v46 = vld [vmem:[#allocation11 + $0x28] sm:$0xff]  }
  0xda   : > { %v1221_v23 = vadd.f32 %v1213_v13, %v1191_v11  ;;  %v1333_v13 = vmul.f32 %v3441_v36, %v3362_v41 }
  0xdb   : > { %600 = vmatpush1.bf16.msra.mxu0 %v2665_v14  ;;  %931 = vmatpush1.bf16.msra.mxu1 %v2665_v14  ;;  %v1102_v14 = vadd.f32 %v1094_v56, %v3344_v32 }
  0xdc   : > { %601 = vmatprep.subr.bf16.mxu0 %v2666_v15  ;;  %932 = vmatprep.subr.bf16.mxu1 %v2666_v15  ;;  %v1103_v15 = vadd.f32 %v1095_v57, %v3344_v32  ;;  %v1251_v52 = vadd.f32 %v1243_v29, %v1221_v23  ;;  %v1155_v23 = vmul.f32 %v3367_v43, %v3459_v3 }
  0xdd   : > { %v3486_v29 = vrot.slane %v3383_v51, %v3350_v34 }
  0xde   : > { %v1281_v11 = vadd.f32 %v1273_v54, %v1251_v52 }
  0xdf   : > { %602 = vmatpush1.bf16.msra.mxu0 %v2668_v16  ;;  %933 = vmatpush1.bf16.msra.mxu1 %v2668_v16  ;;  %v1124_v16 = vmul.f32 %v3355_v37, %v3397_v61 }
  0xe0   : > { %2523 = vmatprep.subr.bf16.mxu1 %v2671_v63  ;;  %2499 = vmatprep.subr.bf16.mxu0 %v2671_v63 }
  0xe1   : > { %v1132_v56 = vadd.f32 %v1124_v16, %v1102_v14  ;;  %v1154_v14 = vmul.f32 %v3367_v43, %v3445_v45  ;;  %v3472_v16 = vrot.slane %v3383_v51, %v3347_v33 }
  0xe2   : > { %620 = vmatmul.mubr.bf16.vlgmr.msra.gmra.mrb[0].mxu0 %v2669_v17  ;;  %v1125_v17 = vmul.f32 %v3355_v37, %v3399_v62  ;;  %951 = vmatmul.mubr.bf16.vlgmr.msra.gmra.mrb[0].mxu1 %v2672_v1  ;;  %v3503_v1 = vrot.slane %v3383_v51, %v3358_v38 }
  0xe3   : > { %629 = vmatprep.mubr.bf16.mxu0 %v2982_v0  ;;  %2531 = vmatpush3.bf16.msra.mxu1 %v2671_v63  ;;  %v1393_v52 = vmul.f32 %v3472_v16, %v3445_v45  ;;  %v3494_v54 = vadd.f32 %v1154_v14, %v1132_v56  ;;  %v3515_v14 = vld [vmem:[#allocation2 + $0x35] sm:$0xff] }
  0xe4   : > { %v1133_v57 = vadd.f32 %v1125_v17, %v1103_v15  ;;  %v1362_v15 = vmul.f32 %v3456_v59, %v3360_v40  ;;  %v3474_v17 = vld [vmem:[#allocation9 + $0x18] sm:$0x7f]  ;;  %2500 = vmatpush3.bf16.msra.mxu0 %v2671_v63  ;;  %2524 = vmatprep.subr.bf16.mxu1 %v2673_v2  ;;  %v2674_v40 = vld [vmem:[#allocation11 + $0x10] sm:$0xff]  }
  0xe5   : > { %2501 = vmatprep.subr.bf16.mxu0 %v2673_v2  ;;  %960 = vmatprep.mubr.bf16.mxu1 %v2982_v0  ;;  %v3499_v63 = vld [vmem:[#allocation2 + $0x34] sm:$0xff]  ;;  %v3573_v43 = vrot.slane %v3474_v17, %v3341_v31 }
  0xe6   : > { %v1423_v56 = vmul.f32 %v3486_v29, %v3499_v63 }
  0xe7   : > { %2532 = vmatpush3.bf16.msra.mxu1 %v2673_v2 }
  0xe8   : > { %2502 = vmatpush3.bf16.msra.mxu0 %v2673_v2  ;;  %2525 = vmatprep.subr.bf16.mxu1 %v2674_v40  ;;  %v3528_v2 = vrot.slane %v3474_v17, %v3324_v22 }
  0xe9   : > { %2503 = vmatprep.subr.bf16.mxu0 %v2674_v40 }
  0xea   : > { %630 = vmatmul.mubr.bf16.gmra.mrb[4].mxu0 %v2670_v18  ;;  %v1230_v18 = vld [vmem:[#allocation2 + $0x26] sm:$0xff] }
  0xeb   : > { %639 = vmatprep.mubr.bf16.mxu0 %v2982_v0  ;;  %v1242_v24 = vmul.f32 %v3412_v6, %v1230_v18  ;;  %v1311_v18 = vadd.f32 %v3433_v30, %v1281_v11  ;;  %v1422_v11 = vmul.f32 %v3486_v29, %v3395_v60  ;;  %v2679_v60 = vld [vmem:[%s3293_s4 + $0x18] sm:$0xff]   ;;  %2533 = vmatpush3.bf16.msra.mxu1 %v2674_v40  ;;  %s4053_s4 = scalar_lea.hbm %s4212_s26, %s2486_s21 }
  0xec   : > { %2504 = vmatpush3.bf16.msra.mxu0 %v2674_v40 }
  0xed   : > { %v1250_v49 = vadd.f32 %v1242_v24, %v1220_v20  ;;  %v1363_v20 = vmul.f32 %v3456_v59, %v3397_v61  ;;  %v1392_v24 = vmul.f32 %v3472_v16, %v3381_v50  ;;  %v2680_v50 = vld [vmem:[%s3301_s16 + $0x8] sm:$0xff]   ;;  %s2881_s16 = sshll.u32 %s2984_s2, 4  ;;  %s2882_s16 = int_to_ptr.vmem [resolvable:$false] %s2881_s16 }
  0xee   : > { %961 = vmatmul.mubr.bf16.gmra.mrb[4].mxu1 %v2680_v50  ;;  %s2883_s11 = scalar_lea.vmem %s2882_s16, 2048  ;;  %p2884_p13 = scmp.lt.s32.totalorder %s4048_s19, %s2882_s16 }
  0xef   : > { %v1280_v10 = vadd.f32 %v1272_v53, %v1250_v49  ;;  %v1341_v49 = vadd.f32 %v1333_v13, %v1311_v18  ;;  %v3492_v53 = vrot.slane %v3474_v17, %v3329_v26  ;;  %v2675_v13 = vld [vmem:[#allocation11 + $0x18] sm:$0xff]   ;;  %p2885_p3 = scmp.lt.s32.totalorder %s2883_s11, %s2877_s25 }
  0xf0   : > { %2526 = vmatprep.subr.bf16.mxu1 %v2675_v13  ;;  %2505 = vmatprep.subr.bf16.mxu0 %v2675_v13 }
  0xf1   : > { %v1310_v25 = vadd.f32 %v3433_v30, %v1280_v10  ;;  %v1371_v10 = vadd.f32 %v1363_v20, %v1341_v49  ;;  %v1453_v20 = vmul.f32 %v3503_v1, %v3515_v14  ;;  %2534 = vmatpush3.bf16.msra.mxu1 %v2675_v13  ;;  %2506 = vmatpush3.bf16.msra.mxu0 %v2675_v13  ;;  %p2886_p5 = por %p2885_p3, %p2884_p13 }
  0xf2   : > { %640 = vmatmul.mubr.bf16.gmra.mrb[8].mxu0 %v2676_v7  ;;  %v1214_v13 = vmul.f32 %v3515_v14, %v3393_v58 }
  0xf3   : > { %v1340_v39 = vadd.f32 %v1332_v12, %v1310_v25  ;;  %649 = vmatprep.mubr.bf16.mxu0 %v2982_v0  ;;  %v3509_v12 = vadd.f32 %v1155_v23, %v1133_v57  ;;  %v3513_v0 = vrot.slane %v3416_v9, %v3324_v22  ;;  %v1401_v18 = vadd.f32 %v1393_v52, %v1371_v10  ;;  %v3530_v23 = vld [vmem:[#allocation2 + $0x36] sm:$0xff]  ;;  %p2887_p11 = pnand %p2886_p5, %p2880_p2 }
  0xf4   : > { %v1452_v57 = vmul.f32 %v3503_v1, %v3414_v8  ;;  %v3542_v8 = vrot.slane %v3416_v9, %v3350_v34  ;;  %v3548_v10 = vld [vmem:[#allocation2 + $0x37] sm:$0xff] }
  0xf5   : > { %v1370_v7 = vadd.f32 %v1362_v15, %v1340_v39  ;;  %v3519_v15 = vrot.slane %v3383_v51, %v3379_v48  ;;  %v3534_v51 = vrot.slane %v3416_v9, %v3341_v31  ;;  %v1431_v49 = vadd.f32 %v1423_v56, %v1401_v18  ;;  %v3565_v18 = vld [vmem:[#allocation2 + $0x3c] sm:$0xff] }
  0xf6   : > { %v1513_v40 = vmul.f32 %v3452_v55, %v3548_v10 }
  0xf7   : > { %v1400_v25 = vadd.f32 %v1392_v24, %v1370_v7  ;;  %v3538_v24 = vrot.slane %v3416_v9, %v3347_v33  ;;  %v1482_v52 = vmul.f32 %v3519_v15, %v3427_v19  ;;  %v1483_v50 = vmul.f32 %v3519_v15, %v3530_v23  ;;  %v2677_v7 = vld [vmem:[#allocation11 + $0x20] sm:$0xff]  }
  0xf8   : > { %v1461_v56 = vadd.f32 %v1453_v20, %v1431_v49  ;;  %v1573_v49 = vmul.f32 %v3513_v0, %v3364_v42  ;;  %2527 = vmatprep.subr.bf16.mxu1 %v2677_v7  ;;  %v1602_v31 = vmul.f32 %v3534_v51, %v3397_v61  ;;  %2507 = vmatprep.subr.bf16.mxu0 %v2677_v7 }
  0xf9   : > { %v1430_v39 = vadd.f32 %v1422_v11, %v1400_v25  ;;  %v3558_v11 = vrot.slane %v3416_v9, %v3379_v48  ;;  %v3563_v25 = vmul.f32 0.0, %v3437_v35  ;;  %v3583_v35 = vld [vmem:[#allocation2 + $0x3d] sm:$0xff]  ;;  %v1632_v61 = vmul.f32 %v3538_v24, %v3445_v45  ;;  %2535 = vmatpush3.bf16.msra.mxu1 %v2677_v7  ;;  %2508 = vmatpush3.bf16.msra.mxu0 %v2677_v7 }
  0xfa   : > { %650 = vmatmul.mubr.bf16.gmra.mrb[12].mxu0 %v2679_v60  ;;  %v3577_v60 = vrot.slane %v3474_v17, %v3347_v33  ;;  %v1491_v20 = vadd.f32 %v1483_v50, %v1461_v56  ;;  %v1603_v33 = vmul.f32 %v3534_v51, %v3399_v62  ;;  %v3589_v9 = vld [vmem:[#allocation2 + $0x3e] sm:$0xff]  ;;  %v1215_v32 = vmul.f32 %v3583_v35, %v3393_v58 }
  0xfb   : > { %v1460_v19 = vadd.f32 %v1452_v57, %v1430_v39  ;;  %v1572_v39 = vmul.f32 %v3513_v0, %v3362_v41  ;;  %v3599_v56 = vld [vmem:[#allocation2 + $0x3f] sm:$0xff]  ;;  %v1245_v45 = vmul.f32 %v3589_v9, %v3412_v6  ;;  %2528 = vmatprep.subr.bf16.mxu1 %v2678_v46  ;;  %v1274_v58 = vmul.f32 %v3548_v10, %v3405_v4 }
  0xfc   : > { %v1521_v50 = vadd.f32 %v1513_v40, %v1491_v20  ;;  %2509 = vmatprep.subr.bf16.mxu0 %v2678_v46  ;;  %v1662_v7 = vmul.f32 %v3542_v8, %v3499_v63 }
  0xfd   : > { %v1490_v57 = vadd.f32 %v1482_v52, %v1460_v19  ;;  %v1184_v52 = vmul.f32 %v3499_v63, %v3376_v47  ;;  %v1185_v19 = vmul.f32 %v3565_v18, %v3376_v47  ;;  %v2681_v47 = vld [vmem:[#allocation11 + $0x30] sm:$0xff]   ;;  %2536 = vmatpush3.bf16.msra.mxu1 %v2678_v46  ;;  %2510 = vmatpush3.bf16.msra.mxu0 %v2678_v46  ;;  %v2682_v63 = vld [vmem:[#allocation11 + $0x38] sm:$0xff]  }
  0xfe   : > { %2529 = vmatprep.subr.bf16.mxu1 %v2681_v47  ;;  %2511 = vmatprep.subr.bf16.mxu0 %v2681_v47  ;;  %v1723_v46 = vmul.f32 %v3558_v11, %v3589_v9 }
  0xff   : > { %v1520_v41 = vadd.f32 %v1512_v5, %v1490_v57  ;;  %v1192_v37 = vadd.f32 %v1184_v52, %v3494_v54  ;;  %v1244_v5 = vmul.f32 %v3530_v23, %v3412_v6  ;;  %v1551_v57 = vadd.f32 %v3563_v25, %v1521_v50  ;;  %v1322_v50 = vld [vmem:[#allocation2 + $0x39] sm:$0xff] }
 0x100   : > { %v1193_v20 = vadd.f32 %v1185_v19, %v3509_v12  ;;  %v1633_v54 = vmul.f32 %v3538_v24, %v3459_v3  ;;  %v1275_v12 = vmul.f32 %v3599_v56, %v3405_v4  ;;  %v1663_v19 = vmul.f32 %v3542_v8, %v3565_v18  ;;  %v3629_v4 = vld [vmem:[#allocation2 + $0x42] sm:$0xff] }
 0x101   : > { %v1550_v40 = vadd.f32 %v3563_v25, %v1520_v41  ;;  %v1222_v52 = vadd.f32 %v1214_v13, %v1192_v37  ;;  %v1581_v41 = vadd.f32 %v1573_v49, %v1551_v57  ;;  %v1692_v37 = vmul.f32 %v3554_v28, %v3515_v14  ;;  %v3623_v13 = vld [vmem:[#allocation2 + $0x41] sm:$0xff]  ;;  %2537 = vmatpush3.bf16.msra.mxu1 %v2681_v47 }
 0x102   : > { %v1223_v21 = vadd.f32 %v1215_v32, %v1193_v20  ;;  %v1693_v32 = vmul.f32 %v3554_v28, %v3583_v35  ;;  %v1352_v57 = vld [vmem:[#allocation2 + $0x3a] sm:$0xff]  ;;  %v1722_v20 = vmul.f32 %v3558_v11, %v3530_v23  ;;  %v1334_v22 = vmul.f32 %v3441_v36, %v1322_v50  ;;  %v3638_v23 = vld [vmem:[#allocation2 + $0x43] sm:$0xff]  ;;  %2512 = vmatpush3.bf16.msra.mxu0 %v2681_v47 }
 0x103   : > { %v1580_v27 = vadd.f32 %v1572_v39, %v1550_v40  ;;  %v1252_v6 = vadd.f32 %v1244_v5, %v1222_v52  ;;  %v1611_v49 = vadd.f32 %v1603_v33, %v1581_v41  ;;  %v1335_v33 = vmul.f32 %v3623_v13, %v3441_v36  ;;  %2530 = vmatprep.subr.bf16.mxu1 %v2682_v63 }
 0x104   : > { %v1253_v40 = vadd.f32 %v1245_v45, %v1223_v21  ;;  %v1382_v21 = vld [vmem:[#allocation2 + $0x3b] sm:$0xff]  ;;  %v1752_v45 = vmul.f32 %v3569_v44, %v3548_v10  ;;  %v1365_v41 = vmul.f32 %v3629_v4, %v3456_v59  ;;  %v3647_v10 = vld [vmem:[#allocation2 + $0x44] sm:$0xff]  ;;  %2513 = vmatprep.subr.bf16.mxu0 %v2682_v63  ;;  %v3657_v47 = vrot.slane %v3474_v17, %v3350_v34 }
 0x105   : > { %v1610_v39 = vadd.f32 %v1602_v31, %v1580_v27  ;;  %v1282_v14 = vadd.f32 %v1274_v58, %v1252_v6  ;;  %v1641_v27 = vadd.f32 %v1633_v54, %v1611_v49  ;;  %v1364_v6 = vmul.f32 %v3456_v59, %v1352_v57  ;;  %2538 = vmatpush3.bf16.msra.mxu1 %v2682_v63 }
 0x106   : > { %v1283_v31 = vadd.f32 %v1275_v12, %v1253_v40  ;;  %v1753_v12 = vmul.f32 %v3569_v44, %v3599_v56  ;;  %v3653_v57 = vmul.f32 0.0, %v3492_v53  ;;  %2514 = vmatpush3.bf16.msra.mxu0 %v2682_v63  ;;  %v1813_v34 = vmul.f32 %v3528_v2, %v3623_v13 }
 0x107   : > { %v1640_v5 = vadd.f32 %v1632_v61, %v1610_v39  ;;  %v1312_v58 = vadd.f32 %v3433_v30, %v1282_v14  ;;  %v1671_v54 = vadd.f32 %v1663_v19, %v1641_v27  ;;  %v1394_v39 = vmul.f32 %v3472_v16, %v1382_v21  ;;  %v3659_v14 = vld [vmem:[#allocation2 + $0x45] sm:$0xff] }
 0x108   : > { %v1313_v52 = vadd.f32 %v3433_v30, %v1283_v31  ;;  %v1395_v19 = vmul.f32 %v3638_v23, %v3472_v16  ;;  %v1425_v31 = vmul.f32 %v3647_v10, %v3486_v29  ;;  %v3669_v21 = vld [vmem:[#allocation2 + $0x46] sm:$0xff]  ;;  %v1842_v63 = vmul.f32 %v3573_v43, %v3399_v62 }
 0x109   : > { %v1670_v61 = vadd.f32 %v1662_v7, %v1640_v5  ;;  %v1342_v50 = vadd.f32 %v1334_v22, %v1312_v58  ;;  %v1701_v40 = vadd.f32 %v1693_v32, %v1671_v54  ;;  %v1424_v22 = vmul.f32 %v3565_v18, %v3486_v29 }
 0x10a   : > { %v1343_v7 = vadd.f32 %v1335_v33, %v1313_v52  ;;  %v1812_v33 = vmul.f32 %v3528_v2, %v3364_v42  ;;  %v1455_v54 = vmul.f32 %v3659_v14, %v3503_v1  ;;  %v1843_v42 = vmul.f32 %v3573_v43, %v3629_v4 }
 0x10b   : > { %v1700_v49 = vadd.f32 %v1692_v37, %v1670_v61  ;;  %v1372_v5 = vadd.f32 %v1364_v6, %v1342_v50  ;;  %v1731_v32 = vadd.f32 %v1723_v46, %v1701_v40  ;;  %v1454_v6 = vmul.f32 %v3583_v35, %v3503_v1  ;;  %v3681_v50 = vld [vmem:[#allocation2 + $0x47] sm:$0xff] }
 0x10c   : > { %v1373_v27 = vadd.f32 %v1365_v41, %v1343_v7  ;;  %v1484_v41 = vmul.f32 %v3589_v9, %v3519_v15  ;;  %v1872_v62 = vmul.f32 %v3577_v60, %v3459_v3  ;;  %v1873_v40 = vmul.f32 %v3577_v60, %v3638_v23 }
 0x10d   : > { %v1730_v37 = vadd.f32 %v1722_v20, %v1700_v49  ;;  %v1402_v58 = vadd.f32 %v1394_v39, %v1372_v5  ;;  %v1761_v20 = vadd.f32 %v1753_v12, %v1731_v32  ;;  %v1485_v49 = vmul.f32 %v3669_v21, %v3519_v15 }
 0x10e   : > { %v1403_v46 = vadd.f32 %v1395_v19, %v1373_v27  ;;  %v1514_v19 = vmul.f32 %v3599_v56, %v3452_v55  ;;  %v1515_v32 = vmul.f32 %v3452_v55, %v3681_v50  ;;  %v1902_v27 = vmul.f32 %v3657_v47, %v3565_v18 }
 0x10f   : > { %v1760_v61 = vadd.f32 %v1752_v45, %v1730_v37  ;;  %v1432_v52 = vadd.f32 %v1424_v22, %v1402_v58  ;;  %v1791_v45 = vadd.f32 %v3653_v57, %v1761_v20  ;;  %v3703_v3 = vrot.slane %v3474_v17, %v3379_v48  ;;  %v1593_v48 = vld [vmem:[#allocation2 + $0x4a] sm:$0xff] }
 0x110   : > { %v1433_v12 = vadd.f32 %v1425_v31, %v1403_v46  ;;  %v3699_v31 = vrot.slane %v3474_v17, %v3358_v38  ;;  %v1574_v46 = vmul.f32 %v3623_v13, %v3513_v0 }
 0x111   : > { %v1790_v39 = vadd.f32 %v3653_v57, %v1760_v61  ;;  %v1462_v7 = vadd.f32 %v1454_v6, %v1432_v52  ;;  %v1821_v22 = vadd.f32 %v1813_v34, %v1791_v45  ;;  %4193 = vst [vmem:[#allocation35_spill] sm:$0xff] %v3703_v3  ;;  %v1563_v6 = vld [vmem:[#allocation2 + $0x49] sm:$0xff]  ;;  %v1903_v34 = vmul.f32 %v3657_v47, %v3647_v10 }
 0x112   : > { %v1463_v37 = vadd.f32 %v1455_v54, %v1433_v12  ;;  %4192 = vst [vmem:[#allocation34_spill] sm:$0xff] %v3699_v31  ;;  %v1932_v20 = vmul.f32 %v3699_v31, %v3583_v35  ;;  %v1933_v18 = vmul.f32 %v3699_v31, %v3659_v14  ;;  %v1623_v45 = vld [vmem:[#allocation2 + $0x4b] sm:$0xff] }
 0x113   : > { %v1820_v5 = vadd.f32 %v1812_v33, %v1790_v39  ;;  %v1492_v58 = vadd.f32 %v1484_v41, %v1462_v7  ;;  %v1851_v33 = vadd.f32 %v1843_v42, %v1821_v22  ;;  %v1962_v42 = vmul.f32 %v3703_v3, %v3589_v9  ;;  %v1653_v9 = vld [vmem:[#allocation2 + $0x4c] sm:$0xff] }
 0x114   : > { %v1493_v61 = vadd.f32 %v1485_v49, %v1463_v37  ;;  %v1963_v41 = vmul.f32 %v3703_v3, %v3669_v21  ;;  %v1604_v39 = vmul.f32 %v3629_v4, %v3534_v51  ;;  %v1634_v7 = vmul.f32 %v3638_v23, %v3538_v24  ;;  %v3732_v23 = vld [vmem:[%s4107_s5] ss:$0 sm:$0xff] }
 0x115   : > { %v1850_v56 = vadd.f32 %v1842_v63, %v1820_v5  ;;  %v1522_v38 = vadd.f32 %v1514_v19, %v1492_v58  ;;  %v1881_v54 = vadd.f32 %v1873_v40, %v1851_v33  ;;  %v1575_v63 = vmul.f32 %v3513_v0, %v1563_v6  ;;  %4194 = vst [vmem:[#allocation36_spill] sm:$0xff] %v3732_v23 }
 0x116   : > { %v1523_v52 = vadd.f32 %v1515_v32, %v1493_v61  ;;  %v1635_v37 = vmul.f32 %v3538_v24, %v1623_v45  ;;  %v1664_v4 = vmul.f32 %v3647_v10, %v3542_v8 }
 0x117   : > { %v1880_v17 = vadd.f32 %v1872_v62, %v1850_v56  ;;  %v1552_v35 = vadd.f32 %v3563_v25, %v1522_v38  ;;  %v1911_v13 = vadd.f32 %v1903_v34, %v1881_v54  ;;  %v1605_v62 = vmul.f32 %v3534_v51, %v1593_v48 }
 0x118   : > { %v1553_v49 = vadd.f32 %v3563_v25, %v1523_v52  ;;  %v1665_v34 = vmul.f32 %v3542_v8, %v1653_v9  ;;  %v1724_v52 = vmul.f32 %v3669_v21, %v3558_v11 }
 0x119   : > { %v1910_v12 = vadd.f32 %v1902_v27, %v1880_v17  ;;  %v1582_v40 = vadd.f32 %v1574_v46, %v1552_v35  ;;  %v1941_v5 = vadd.f32 %v1933_v18, %v1911_v13  ;;  %v1683_v27 = vld [vmem:[#allocation2 + $0x4d] sm:$0xff] }
 0x11a   : > { %v1583_v22 = vadd.f32 %v1575_v63, %v1553_v49  ;;  %v1713_v18 = vld [vmem:[#allocation2 + $0x4e] sm:$0xff]  ;;  %v1695_v17 = vmul.f32 %v3554_v28, %v1683_v27 }
 0x11b   : > { %v1940_v19 = vadd.f32 %v1932_v20, %v1910_v12  ;;  %v1612_v32 = vadd.f32 %v1604_v39, %v1582_v40  ;;  %v1971_v56 = vadd.f32 %v1963_v41, %v1941_v5  ;;  %v1694_v20 = vmul.f32 %v3659_v14, %v3554_v28  ;;  %v1743_v63 = vld [vmem:[#allocation2 + $0x4f] sm:$0xff] }
 0x11c   : > { %v1613_v33 = vadd.f32 %v1605_v62, %v1583_v22  ;;  %v1725_v35 = vmul.f32 %v3558_v11, %v1713_v18  ;;  %v1754_v12 = vmul.f32 %v3569_v44, %v3681_v50  ;;  %v1755_v49 = vmul.f32 %v3569_v44, %v1743_v63  ;;  %v1803_v40 = vld [vmem:[#allocation2 + $0x51] sm:$0xff] }
 0x11d   : > { %v1970_v58 = vadd.f32 %v1962_v42, %v1940_v19  ;;  %v1642_v61 = vadd.f32 %v1634_v7, %v1612_v32  ;;  %v3740_v10 = vadd.f32 %v3732_v23, %v1971_v56  ;;  %v1814_v19 = vmul.f32 %v3528_v2, %v1563_v6  ;;  %v1833_v5 = vld [vmem:[#allocation2 + $0x52] sm:$0xff] }
 0x11e   : > { %v1643_v46 = vadd.f32 %v1635_v37, %v1613_v33  ;;  %v1815_v37 = vmul.f32 %v3528_v2, %v1803_v40  ;;  %v1863_v50 = vld [vmem:[#allocation2 + $0x53] sm:$0xff]  ;;  %v1845_v56 = vmul.f32 %v3573_v43, %v1833_v5 }
 0x11f   : > { %v3737_v38 = vadd.f32 %v3732_v23, %v1970_v58  ;;  %v1672_v54 = vadd.f32 %v1664_v4, %v1642_v61  ;;  %v2467_v41 = vmul.f32 -1.442695, %v3740_v10  ;;  %v1844_v4 = vmul.f32 %v3573_v43, %v1593_v48  ;;  %v1893_v61 = vld [vmem:[#allocation2 + $0x54] sm:$0xff] }
 0x120   : > { %v1673_v14 = vadd.f32 %v1665_v34, %v1643_v46  ;;  %v1874_v34 = vmul.f32 %v3577_v60, %v1623_v45  ;;  %v1875_v6 = vmul.f32 %v3577_v60, %v1863_v50  ;;  %v447_v46 = vld [vmem:[%s4105_s3] sm:$0x3]  ;;  %v1923_v48 = vld [vmem:[#allocation2 + $0x55] sm:$0xff]  ;;  %v1934_v45 = vmul.f32 %v3699_v31, %v1683_v27 }
 0x121   : > { %v2466_v42 = vmul.f32 -1.442695, %v3737_v38  ;;  %v1702_v39 = vadd.f32 %v1694_v20, %v1672_v54  ;;  %v1904_v54 = vmul.f32 %v3657_v47, %v1653_v9 }
 0x122   : > { %v1703_v13 = vadd.f32 %v1695_v17, %v1673_v14 }
 0x123   : > { %2683 = vpow2.f32 %v2466_v42  ;;  %v1732_v62 = vadd.f32 %v1724_v52, %v1702_v39  ;;  %v1905_v42 = vmul.f32 %v3657_v47, %v1893_v61  ;;  %v1953_v39 = vld [vmem:[#allocation2 + $0x56] sm:$0xff] }
 0x124   : > { %2685 = vpow2.f32 %v2467_v41  ;;  %v1733_v21 = vadd.f32 %v1725_v35, %v1703_v13 }
 0x125   : > { %v1762_v7 = vadd.f32 %v1754_v12, %v1732_v62  ;;  %v476_v12 = vrot.slane %v447_v46, %v3329_v26  ;;  %v1935_v62 = vmul.f32 %v3699_v31, %v1923_v48 }
 0x126   : > { %v1763_v22 = vadd.f32 %v1755_v49, %v1733_v21  ;;  %v4195_v21 = vld [vmem:[#allocation22_spill] sm:$0xff] }
 0x127   : > { %v1792_v32 = vadd.f32 %v3653_v57, %v1762_v7  ;;  %v480_v9 = vrot.slane %v447_v46, %v4195_v21 }
 0x128   : > { %v1793_v58 = vadd.f32 %v3653_v57, %v1763_v22 }
 0x129   : > { %v1822_v33 = vadd.f32 %v1814_v19, %v1792_v32  ;;  %v1964_v19 = vmul.f32 %v3703_v3, %v1713_v18 }
 0x12a   : > { %v1823_v20 = vadd.f32 %v1815_v37, %v1793_v58  ;;  %v1965_v37 = vmul.f32 %v3703_v3, %v1953_v39 }
 0x12b   : > { %v1852_v17 = vadd.f32 %v1844_v4, %v1822_v33 }
 0x12c   : > { %v1853_v63 = vadd.f32 %v1845_v56, %v1823_v20 }
 0x12d   : > { %v2684_v52 = vpop.eup %2683  ;;  %v1882_v35 = vadd.f32 %v1874_v34, %v1852_v17 }
 0x12e   : > { %v2686_v41 = vpop.eup %2685  ;;  %v2016_v14 = vadd.f32 1.0, %v2684_v52  ;;  %v1883_v49 = vadd.f32 %v1875_v6, %v1853_v63 }
 0x12f   : > { %v2017_v13 = vadd.f32 1.0, %v2686_v41  ;;  %v1912_v7 = vadd.f32 %v1904_v54, %v1882_v35 }
 0x130   : > { %2687 = vrcp.f32 %v2016_v14  ;;  %v1913_v22 = vadd.f32 %v1905_v42, %v1883_v49 }
 0x131   : > { %2689 = vrcp.f32 %v2017_v13  ;;  %v1942_v32 = vadd.f32 %v1934_v45, %v1912_v7 }
 0x132   : > { %v1943_v50 = vadd.f32 %v1935_v62, %v1913_v22  ;;  %v4196_v22 = vld [vmem:[#allocation21_spill] sm:$0xff] }
 0x133   : > { %v1972_v56 = vadd.f32 %v1964_v19, %v1942_v32 }
 0x134   : > { %v1973_v33 = vadd.f32 %v1965_v37, %v1943_v50  ;;  %v721_v37 = vadd.s32 8, %v4196_v22  ;;  %v723_v50 = vadd.s32 24, %v4196_v22 }
 0x135   : > { %v1986_v61 = vadd.f32 %v3732_v23, %v1972_v56 }
 0x136   : > { %v1987_v20 = vadd.f32 %v3732_v23, %v1973_v33 }
 0x137   : > { %v2468_v6 = vmul.f32 -1.442695, %v1986_v61 }
 0x138   : > { %v2469_v54 = vmul.f32 -1.442695, %v1987_v20 }
 0x13a   : > { %v2688_v48 = vpop.eup %2687 }
 0x13b   : > { %v2690_v42 = vpop.eup %2689  ;;  %v2040_v35 = vmul.f32 %v2688_v48, %v3737_v38 }
 0x13c   : > { %v2041_v13 = vmul.f32 %v2690_v42, %v3740_v10  ;;  %v2428_v10 = vadd.s32 4294967281, %v721_v37 }
 0x13e   : > { %v2046_v62 = vpack.c.bf16 %v2041_v13, %v2040_v35  ;;  %vm756_vm0 = vcmp.ge.s32.totalorder %v2428_v10, 0 }
 0x140   : > { %2519 = vmatprep.mubr.bf16.mxu1 %v2046_v62 }
 0x1b5   : > { %v621_v40 = vpop.f32.mrb[0].mxu0 }
 0x1b6   : > { %v623_v5 = vpop.f32.mrb[1].mxu0 }
 0x1b7   : > { %v625_v27 = vpop.f32.mrb[2].mxu0 }
 0x1b8   : > { %v626_v4 = vadd.f32 %v625_v27, %v476_v12  ;;  %v627_v26 = vpop.f32.mrb[3].mxu0 }
 0x1b9   : > { %v628_v58 = vadd.f32 %v627_v26, %v480_v9 }
 0x1bb   : > { %v2420_v34 = vmul.f32 -1.442695, %v628_v58 }
 0x1bd   : > { %2691 = vpow2.f32 %v2420_v34  ;;  %v631_v18 = vpop.f32.mrb[4].mxu0 }
 0x1be   : > { %v632_v46 = vadd.f32 %v631_v18, %v476_v12  ;;  %v633_v17 = vpop.f32.mrb[5].mxu0  ;;  %2693 = vpow2.f32 %v2468_v6  ;;  %v2430_v6 = vadd.s32 4294967281, %v723_v50 }
 0x1bf   : > { %v634_v52 = vadd.f32 %v633_v17, %v480_v9  ;;  %v635_v63 = vpop.f32.mrb[6].mxu0  ;;  %2695 = vpow2.f32 %v2469_v54 }
 0x1c0   : > { %v636_v41 = vadd.f32 %v635_v63, %v476_v12  ;;  %v637_v14 = vpop.f32.mrb[7].mxu0  ;;  %vm766_vm1 = vcmp.lt.s32.totalorder %v2430_v6, 16 }
 0x1c1   : > { %v2421_v45 = vmul.f32 -1.442695, %v634_v52  ;;  %v638_v39 = vadd.f32 %v637_v14, %v480_v9 }
 0x1c3   : > { %2697 = vpow2.f32 %v2421_v45  ;;  %v2422_v49 = vmul.f32 -1.442695, %v638_v39  ;;  %v4197_v45 = vld [vmem:[#allocation23_spill] sm:$0xff] }
 0x1c5   : > { %2699 = vpow2.f32 %v2422_v49  ;;  %v4199_v49 = vld [vmem:[#allocation26_spill] sm:$0xff] }
 0x1c7   : > { %v2692_v40 = vpop.eup %2691 }
 0x1c8   : > { %v685_v21 = vadd.f32 1.0, %v2692_v40  ;;  %v2694_v7 = vpop.eup %2693 }
 0x1c9   : > { %v2696_v19 = vpop.eup %2695  ;;  %v2018_v5 = vadd.f32 1.0, %v2694_v7 }
 0x1ca   : > { %2701 = vrcp.f32 %v685_v21  ;;  %v2019_v12 = vadd.f32 1.0, %v2696_v19  ;;  %v4200_v21 = vld [vmem:[#allocation27_spill] sm:$0xff] }
 0x1cb   : > { %2703 = vrcp.f32 %v2018_v5 }
 0x1cc   : > { %2705 = vrcp.f32 %v2019_v12 }
 0x1cd   : > { %v2698_v38 = vpop.eup %2697 }
 0x1ce   : > { %v686_v9 = vadd.f32 1.0, %v2698_v38 }
 0x1cf   : > { %v2700_v27 = vpop.eup %2699 }
 0x1d0   : > { %2707 = vrcp.f32 %v686_v9  ;;  %v687_v32 = vadd.f32 1.0, %v2700_v27  ;;  %v4202_v9 = vld [vmem:[#allocation28_spill] sm:$0xff] }
 0x1d2   : > { %2709 = vrcp.f32 %v687_v32 }
 0x1d4   : > { %v2702_v26 = vpop.eup %2701 }
 0x1d5   : > { %v709_v58 = vmul.f32 %v2702_v26, %v626_v4  ;;  %v2704_v56 = vpop.eup %2703 }
 0x1d6   : > { %v2706_v33 = vpop.eup %2705  ;;  %v2042_v18 = vmul.f32 %v2704_v56, %v1986_v61 }
 0x1d7   : > { %v780_v34 = vsel %vm756_vm0, %v709_v58, 0.0  ;;  %v2043_v17 = vmul.f32 %v2706_v33, %v1987_v20  ;;  %v4198_v20 = vld [vmem:[#allocation25_spill] sm:$0xff] }
 0x1d8   : > { %788 = vst [vmem:[#allocation2 + $0x8] sm:$0xff] %v780_v34 }
 0x1d9   : > { %v2047_v48 = vpack.c.bf16 %v2043_v17, %v2042_v18  ;;  %v4203_v18 = vld [vmem:[#allocation29_spill] sm:$0xff] }
 0x1da   : > { %v2708_v54 = vpop.eup %2707 }
 0x1db   : > { %v3776_v52 = vmul.f32 %v2708_v54, %v632_v46  ;;  %2520 = vmatmul.mubr.bf16.vlgmr.msra.gmra.mrb[8].mxu1 %v2047_v48 }
 0x1dc   : > { %v2710_v63 = vpop.eup %2709 }
 0x1dd   : > { %789 = vst [vmem:[#allocation2 + $0x10] sm:$0xff] %v3776_v52  ;;  %v711_v42 = vmul.f32 %v2710_v63, %v636_v41  ;;  %v4201_v41 = vld [vmem:[#allocation24_spill] sm:$0xff] }
 0x1de   : > { %v1067_v12 = vmul.f32 %v4201_v41, %v780_v34 }
 0x1df   : > { %v1076_v14 = vld [vmem:[#allocation2 + $0x1] sm:$0xff]  ;;  %v3779_v4 = vsel %vm766_vm1, %v711_v42, 0.0 }
 0x1e0   : > { %v1106_v35 = vld [vmem:[#allocation2 + $0x2] sm:$0xff]  ;;  %v1088_v39 = vmul.f32 %v4197_v45, %v1076_v14  ;;  %790 = vst [vmem:[#allocation2 + $0x18] sm:$0xff] %v3779_v4 }
 0x1e1   : > { %v1136_v61 = vld [vmem:[#allocation2 + $0x3] sm:$0xff]  ;;  %v1118_v46 = vmul.f32 %v4199_v49, %v1106_v35 }
 0x1e2   : > { %v1096_v13 = vadd.f32 %v1088_v39, %v4198_v20  ;;  %v1166_v62 = vld [vmem:[#allocation2 + $0x4] sm:$0xff]  ;;  %v1148_v7 = vmul.f32 %v4200_v21, %v1136_v61  ;;  %v4204_v39 = vld [vmem:[#allocation32_spill] sm:$0xff] }
 0x1e3   : > { %v1196_v22 = vld [vmem:[#allocation2 + $0x5] sm:$0xff]  ;;  %v1178_v27 = vmul.f32 %v4202_v9, %v1166_v62 }
 0x1e4   : > { %v1126_v40 = vadd.f32 %v1118_v46, %v1096_v13  ;;  %v1077_v19 = vld [vmem:[#allocation2 + $0x9] sm:$0xff]  ;;  %v1208_v6 = vmul.f32 %v4203_v18, %v1196_v22  ;;  %v1068_v13 = vmul.f32 %v4201_v41, %v3776_v52  ;;  %v1069_v46 = vmul.f32 %v4201_v41, %v3779_v4 }
 0x1e5   : > { %v1107_v5 = vld [vmem:[#allocation2 + $0xa] sm:$0xff]  ;;  %v1089_v37 = vmul.f32 %v4197_v45, %v1077_v19 }
 0x1e6   : > { %v1156_v38 = vadd.f32 %v1148_v7, %v1126_v40  ;;  %v1137_v10 = vld [vmem:[#allocation2 + $0xb] sm:$0xff]  ;;  %v1119_v26 = vmul.f32 %v4199_v49, %v1107_v5 }
 0x1e7   : > { %v1226_v32 = vld [vmem:[#allocation2 + $0x6] sm:$0xff]  ;;  %v3790_v50 = vld [vmem:[#allocation2 + $0x11] sm:$0xff]  ;;  %v3792_v58 = vld [vmem:[#allocation2 + $0x19] sm:$0xff]  ;;  %v1097_v56 = vadd.f32 %v1089_v37, %v1067_v12  ;;  %v1149_v42 = vmul.f32 %v4200_v21, %v1137_v10 }
 0x1e8   : > { %v1186_v33 = vadd.f32 %v1178_v27, %v1156_v38  ;;  %v1167_v17 = vld [vmem:[#allocation2 + $0xc] sm:$0xff]  ;;  %v1090_v54 = vmul.f32 %v4197_v45, %v3790_v50  ;;  %v1091_v48 = vmul.f32 %v4197_v45, %v3792_v58  ;;  %v1238_v61 = vmul.f32 %v4204_v39, %v1226_v32  ;;  %v3808_v7 = vld [vmem:[#allocation2 + $0x1a] sm:$0xff] }
 0x1e9   : > { %v1256_v63 = vld [vmem:[#allocation2 + $0x7] sm:$0xff]  ;;  %v1127_v14 = vadd.f32 %v1119_v26, %v1097_v56  ;;  %v1179_v62 = vmul.f32 %v4202_v9, %v1167_v17  ;;  %v3806_v40 = vld [vmem:[#allocation2 + $0x12] sm:$0xff]  ;;  %v1121_v31 = vmul.f32 %v4199_v49, %v3808_v7 }
 0x1ea   : > { %v1216_v35 = vadd.f32 %v1208_v6, %v1186_v33  ;;  %v1197_v20 = vld [vmem:[#allocation2 + $0xd] sm:$0xff]  ;;  %v1098_v27 = vadd.f32 %v1090_v54, %v1068_v13  ;;  %v1099_v32 = vadd.f32 %v1091_v48, %v1069_v46  ;;  %v1120_v3 = vmul.f32 %v4199_v49, %v3806_v40 }
 0x1eb   : > { %v1157_v45 = vadd.f32 %v1149_v42, %v1127_v14  ;;  %v4205_v22 = vld [vmem:[#allocation30_spill] sm:$0xff]  ;;  %v1209_v26 = vmul.f32 %v4203_v18, %v1197_v20  ;;  %v4206_v6 = vld [vmem:[#allocation31_spill] sm:$0xff] }
 0x1ec   : > { %v1246_v12 = vadd.f32 %v1238_v61, %v1216_v35  ;;  %v1268_v37 = vmul.f32 %v4205_v22, %v1256_v63  ;;  %v1227_v38 = vld [vmem:[#allocation2 + $0xe] sm:$0xff]  ;;  %v1298_v23 = vmul.f32 %v4206_v6, %v780_v34  ;;  %v3820_v63 = vld [vmem:[#allocation2 + $0x1b] sm:$0xff]  ;;  %v1328_v35 = vmul.f32 %v3441_v36, %v1077_v19 }
 0x1ed   : > { %v1187_v56 = vadd.f32 %v1179_v62, %v1157_v45  ;;  %v1257_v41 = vld [vmem:[#allocation2 + $0xf] sm:$0xff]  ;;  %v1239_v42 = vmul.f32 %v4204_v39, %v1227_v38  ;;  %v1128_v61 = vadd.f32 %v1120_v3, %v1098_v27  ;;  %v1129_v13 = vadd.f32 %v1121_v31, %v1099_v32  ;;  %v3833_v3 = vld [vmem:[#allocation2 + $0x1c] sm:$0xff] }
 0x1ee   : > { %v1276_v33 = vadd.f32 %v1268_v37, %v1246_v12  ;;  %v3818_v14 = vld [vmem:[#allocation2 + $0x13] sm:$0xff]  ;;  %v1269_v34 = vmul.f32 %v4205_v22, %v1257_v41  ;;  %v1358_v62 = vmul.f32 %v3456_v59, %v1107_v5  ;;  %v1151_v45 = vmul.f32 %v4200_v21, %v3820_v63 }
 0x1ef   : > { %v1217_v54 = vadd.f32 %v1209_v26, %v1187_v56  ;;  %v1150_v49 = vmul.f32 %v4200_v21, %v3818_v14  ;;  %v3831_v26 = vld [vmem:[#allocation2 + $0x14] sm:$0xff]  ;;  %v1388_v5 = vmul.f32 %v3472_v16, %v1137_v10  ;;  %v1329_v21 = vmul.f32 %v3441_v36, %v3790_v50 }
 0x1f0   : > { %v1306_v48 = vadd.f32 %v1298_v23, %v1276_v33  ;;  %v1299_v23 = vmul.f32 %v4206_v6, %v3776_v52  ;;  %v1159_v19 = vadd.f32 %v1151_v45, %v1129_v13  ;;  %v3836_v32 = vld [vmem:[#allocation2 + $0x15] sm:$0xff]  ;;  %v3840_v33 = vld [vmem:[#allocation2 + $0x1d] sm:$0xff]  ;;  %v1359_v13 = vmul.f32 %v3456_v59, %v3806_v40 }
 0x1f1   : > { %v1247_v46 = vadd.f32 %v1239_v42, %v1217_v54  ;;  %v1158_v31 = vadd.f32 %v1150_v49, %v1128_v61  ;;  %v1418_v54 = vmul.f32 %v3486_v29, %v1167_v17  ;;  %v1181_v61 = vmul.f32 %v3833_v3, %v4202_v9  ;;  %v3856_v49 = vld [vmem:[#allocation2 + $0x17] sm:$0xff] }
 0x1f2   : > { %v1336_v12 = vadd.f32 %v1328_v35, %v1306_v48  ;;  %v3843_v48 = vld [vmem:[#allocation2 + $0x16] sm:$0xff]  ;;  %v1180_v35 = vmul.f32 %v3831_v26, %v4202_v9 }
 0x1f3   : > { %v1277_v37 = vadd.f32 %v1269_v34, %v1247_v46  ;;  %v1448_v34 = vmul.f32 %v3503_v1, %v1197_v20  ;;  %v3852_v46 = vld [vmem:[#allocation2 + $0x1e] sm:$0xff] }
 0x1f4   : > { %v1366_v27 = vadd.f32 %v1358_v62, %v1336_v12  ;;  %v1210_v62 = vmul.f32 %v3836_v32, %v4203_v18  ;;  %v1188_v45 = vadd.f32 %v1180_v35, %v1158_v31  ;;  %v1189_v12 = vadd.f32 %v1181_v61, %v1159_v19  ;;  %v3863_v20 = vld [vmem:[#allocation2 + $0x1f] sm:$0xff] }
 0x1f5   : > { %v1307_v56 = vadd.f32 %v1299_v23, %v1277_v37  ;;  %v1211_v37 = vmul.f32 %v3840_v33, %v4203_v18  ;;  %v1389_v23 = vmul.f32 %v3472_v16, %v3818_v14  ;;  %v1241_v19 = vmul.f32 %v3852_v46, %v4204_v39 }
 0x1f6   : > { %v1396_v42 = vadd.f32 %v1388_v5, %v1366_v27  ;;  %v1478_v27 = vmul.f32 %v3519_v15, %v1227_v38  ;;  %v1240_v5 = vmul.f32 %v3843_v48, %v4204_v39  ;;  %v1508_v35 = vmul.f32 %v3452_v55, %v1257_v41 }
 0x1f7   : > { %v1337_v10 = vadd.f32 %v1329_v21, %v1307_v56  ;;  %v3867_v21 = vld [vmem:[#allocation2 + $0x21] sm:$0xff]  ;;  %v1219_v31 = vadd.f32 %v1211_v37, %v1189_v12  ;;  %v1270_v38 = vmul.f32 %v3856_v49, %v4205_v22  ;;  %v1449_v39 = vmul.f32 %v3503_v1, %v3836_v32  ;;  %v1318_v37 = vld [vmem:[#allocation2 + $0x19] sm:$0xff] }
 0x1f8   : > { %v1426_v17 = vadd.f32 %v1418_v54, %v1396_v42  ;;  %v1218_v42 = vadd.f32 %v1210_v62, %v1188_v45  ;;  %v1419_v54 = vmul.f32 %v3486_v29, %v3831_v26  ;;  %v3878_v62 = vld [vmem:[#allocation2 + $0x22] sm:$0xff]  ;;  %v1331_v41 = vmul.f32 %v3867_v21, %v3441_v36 }
 0x1f9   : > { %v1367_v9 = vadd.f32 %v1359_v13, %v1337_v10  ;;  %v1249_v13 = vadd.f32 %v1241_v19, %v1219_v31  ;;  %v4207_v45 = vld [vmem:[#allocation33_spill] sm:$0xff]  ;;  %v1568_v31 = vmul.f32 %v3513_v0, %v3790_v50  ;;  %v1361_v19 = vmul.f32 %v3456_v59, %v3878_v62 }
 0x1fa   : > { %v1456_v56 = vadd.f32 %v1448_v34, %v1426_v17  ;;  %v1248_v10 = vadd.f32 %v1240_v5, %v1218_v42  ;;  %v1271_v34 = vmul.f32 %v3863_v20, %v4205_v22  ;;  %v1538_v12 = vmul.f32 %v4207_v45, %v3776_v52  ;;  %v3888_v22 = vld [vmem:[#allocation2 + $0x23] sm:$0xff]  ;;  %v1348_v52 = vld [vmem:[#allocation2 + $0x1a] sm:$0xff] }
 0x1fb   : > { %v1397_v18 = vadd.f32 %v1389_v23, %v1367_v9  ;;  %v1300_v9 = vmul.f32 %v4206_v6, %v3779_v4  ;;  %v1479_v42 = vmul.f32 %v3519_v15, %v3843_v48  ;;  %v1378_v50 = vld [vmem:[#allocation2 + $0x1b] sm:$0xff] }
 0x1fc   : > { %v1486_v61 = vadd.f32 %v1478_v27, %v1456_v56  ;;  %v1278_v27 = vadd.f32 %v1270_v38, %v1248_v10  ;;  %v1279_v5 = vadd.f32 %v1271_v34, %v1249_v13  ;;  %v3898_v38 = vld [vmem:[#allocation2 + $0x24] sm:$0xff]  ;;  %v1509_v10 = vmul.f32 %v3452_v55, %v3856_v49 }
 0x1fd   : > { %v1427_v17 = vadd.f32 %v1419_v54, %v1397_v18  ;;  %v1598_v13 = vmul.f32 %v3534_v51, %v3806_v40  ;;  %v1391_v34 = vmul.f32 %v3472_v16, %v3888_v22  ;;  %v1421_v40 = vmul.f32 %v3486_v29, %v3898_v38 }
 0x1fe   : > { %v1516_v23 = vadd.f32 %v1508_v35, %v1486_v61  ;;  %v1308_v54 = vadd.f32 %v1300_v9, %v1278_v27  ;;  %v1309_v6 = vadd.f32 %v3433_v30, %v1279_v5  ;;  %v1330_v35 = vmul.f32 %v3441_v36, %v1318_v37  ;;  %v3907_v9 = vld [vmem:[#allocation2 + $0x25] sm:$0xff] }
 0x1ff   : > { %v1457_v56 = vadd.f32 %v1449_v39, %v1427_v17  ;;  %v1360_v30 = vmul.f32 %v3456_v59, %v1348_v52  ;;  %v1539_v37 = vmul.f32 %v4207_v45, %v3779_v4  ;;  %v1658_v45 = vmul.f32 %v3542_v8, %v3831_v26 }
 0x200   : > { %v1546_v18 = vadd.f32 %v1538_v12, %v1516_v23  ;;  %v1338_v39 = vadd.f32 %v1330_v35, %v1308_v54  ;;  %v1339_v12 = vadd.f32 %v1331_v41, %v1309_v6  ;;  %v1628_v23 = vmul.f32 %v3538_v24, %v3818_v14  ;;  %v3916_v41 = vld [vmem:[#allocation2 + $0x26] sm:$0xff] }
 0x201   : > { %v1487_v61 = vadd.f32 %v1479_v42, %v1457_v56  ;;  %v1390_v42 = vmul.f32 %v3472_v16, %v1378_v50  ;;  %v1451_v14 = vmul.f32 %v3503_v1, %v3907_v9  ;;  %v3926_v6 = vld [vmem:[#allocation2 + $0x27] sm:$0xff]  ;;  %v1599_v35 = vmul.f32 %v3534_v51, %v3808_v7 }
 0x202   : > { %v1576_v17 = vadd.f32 %v1568_v31, %v1546_v18  ;;  %v1368_v5 = vadd.f32 %v1360_v30, %v1338_v39  ;;  %v1369_v56 = vadd.f32 %v1361_v19, %v1339_v12  ;;  %v1569_v31 = vmul.f32 %v3513_v0, %v3792_v58 }
 0x203   : > { %v1517_v36 = vadd.f32 %v1509_v10, %v1487_v61  ;;  %v1420_v19 = vmul.f32 %v3833_v3, %v3486_v29  ;;  %v1688_v61 = vmul.f32 %v3554_v28, %v3836_v32  ;;  %v1481_v26 = vmul.f32 %v3519_v15, %v3916_v41 }
 0x204   : > { %v1606_v27 = vadd.f32 %v1598_v13, %v1576_v17  ;;  %v1398_v18 = vadd.f32 %v1390_v42, %v1368_v5  ;;  %v1399_v54 = vadd.f32 %v1391_v34, %v1369_v56  ;;  %v1450_v34 = vmul.f32 %v3840_v33, %v3503_v1 }
 0x205   : > { %v1547_v59 = vadd.f32 %v1539_v37, %v1517_v36  ;;  %v1629_v29 = vmul.f32 %v3538_v24, %v3820_v63  ;;  %v1718_v39 = vmul.f32 %v3558_v11, %v3843_v48  ;;  %v1511_v12 = vmul.f32 %v3452_v55, %v3926_v6 }
 0x206   : > { %v1636_v52 = vadd.f32 %v1628_v23, %v1606_v27  ;;  %v1428_v13 = vadd.f32 %v1420_v19, %v1398_v18  ;;  %v1429_v50 = vadd.f32 %v1421_v40, %v1399_v54  ;;  %v1480_v37 = vmul.f32 %v3852_v46, %v3519_v15  ;;  %v3944_v23 = vld [vmem:[#allocation2 + $0x29] sm:$0xff] }
 0x207   : > { %v1577_v16 = vadd.f32 %v1569_v31, %v1547_v59  ;;  %v1659_v1 = vmul.f32 %v3542_v8, %v3833_v3  ;;  %v1748_v27 = vmul.f32 %v3569_v44, %v3856_v49  ;;  %v1510_v42 = vmul.f32 %v3863_v20, %v3452_v55  ;;  %v3952_v59 = vld [vmem:[#allocation2 + $0x2a] sm:$0xff] }
 0x208   : > { %v1666_v10 = vadd.f32 %v1658_v45, %v1636_v52  ;;  %v1458_v30 = vadd.f32 %v1450_v34, %v1428_v13  ;;  %v1459_v36 = vadd.f32 %v1451_v14, %v1429_v50  ;;  %v1689_v15 = vmul.f32 %v3554_v28, %v3840_v33  ;;  %v3962_v19 = vld [vmem:[#allocation2 + $0x2b] sm:$0xff] }
 0x209   : > { %v1607_v17 = vadd.f32 %v1599_v35, %v1577_v16  ;;  %v1570_v45 = vmul.f32 %v3867_v21, %v3513_v0  ;;  %v1571_v14 = vmul.f32 %v3513_v0, %v3944_v23  ;;  %v1778_v49 = vmul.f32 %v3492_v53, %v3779_v4 }
 0x20a   : > { %v1696_v32 = vadd.f32 %v1688_v61, %v1666_v10  ;;  %v1488_v48 = vadd.f32 %v1480_v37, %v1458_v30  ;;  %v1489_v56 = vadd.f32 %v1481_v26, %v1459_v36  ;;  %v1719_v16 = vmul.f32 %v3558_v11, %v3852_v46  ;;  %v3974_v10 = vld [vmem:[#allocation2 + $0x2c] sm:$0xff] }
 0x20b   : > { %v1637_v40 = vadd.f32 %v1629_v29, %v1607_v17  ;;  %v1600_v35 = vmul.f32 %v3534_v51, %v3878_v62  ;;  %v1601_v61 = vmul.f32 %v3534_v51, %v3952_v59  ;;  %v1808_v0 = vmul.f32 %v3528_v2, %v3792_v58  ;;  %v3994_v36 = vld [vmem:[#allocation2 + $0x2e] sm:$0xff] }
 0x20c   : > { %v1726_v5 = vadd.f32 %v1718_v39, %v1696_v32  ;;  %v1518_v18 = vadd.f32 %v1510_v42, %v1488_v48  ;;  %v1519_v54 = vadd.f32 %v1511_v12, %v1489_v56  ;;  %v1749_v50 = vmul.f32 %v3569_v44, %v3863_v20  ;;  %v3984_v39 = vld [vmem:[#allocation2 + $0x2d] sm:$0xff]  ;;  %v2728_v42 = vld [vmem:[#allocation2 + $0x23] sm:$0xff] }
 0x20d   : > { %v1667_v31 = vadd.f32 %v1659_v1, %v1637_v40  ;;  %v1630_v62 = vmul.f32 %v3538_v24, %v3888_v22  ;;  %v1631_v51 = vmul.f32 %v3538_v24, %v3962_v19  ;;  %v1838_v58 = vmul.f32 %v3573_v43, %v3808_v7  ;;  %v2727_v40 = vld [vmem:[#allocation2 + $0x22] sm:$0xff]  ;;  %v1739_v48 = vld [vmem:[#allocation2 + $0x2f] sm:$0xff] }
 0x20e   : > { %v1756_v52 = vadd.f32 %v1748_v27, %v1726_v5  ;;  %v1548_v53 = vadd.f32 %v3563_v25, %v1518_v18  ;;  %v1549_v4 = vadd.f32 %v3563_v25, %v1519_v54  ;;  %v1809_v12 = vmul.f32 %v3528_v2, %v3867_v21  ;;  %v2729_v18 = vld [vmem:[#allocation2 + $0x24] sm:$0xff] }
 0x20f   : > { %v1697_v55 = vadd.f32 %v1689_v15, %v1667_v31  ;;  %v1660_v20 = vmul.f32 %v3542_v8, %v3898_v38  ;;  %v1661_v22 = vmul.f32 %v3542_v8, %v3974_v10  ;;  %v1868_v24 = vmul.f32 %v3577_v60, %v3820_v63 }
 0x210   : > { %v1786_v26 = vadd.f32 %v1778_v49, %v1756_v52  ;;  %v1578_v17 = vadd.f32 %v1570_v45, %v1548_v53  ;;  %v1579_v29 = vadd.f32 %v1571_v14, %v1549_v4  ;;  %v1839_v1 = vmul.f32 %v2727_v40, %v3573_v43  ;;  %v2730_v53 = vld [vmem:[#allocation2 + $0x25] sm:$0xff]  ;;  %v1799_v4 = vld [vmem:[#allocation2 + $0x31] sm:$0xff] }
 0x211   : > { %v1727_v13 = vadd.f32 %v1719_v16, %v1697_v55  ;;  %v1690_v21 = vmul.f32 %v3554_v28, %v3907_v9  ;;  %v1691_v38 = vmul.f32 %v3554_v28, %v3984_v39  ;;  %v1898_v27 = vmul.f32 %v3657_v47, %v3833_v3  ;;  %v4208_v28 = vld [vmem:[#allocation34_spill] sm:$0xff] }
 0x212   : > { %v1816_v34 = vadd.f32 %v1808_v0, %v1786_v26  ;;  %v1608_v30 = vadd.f32 %v1600_v35, %v1578_v17  ;;  %v1609_v7 = vadd.f32 %v1601_v61, %v1579_v29  ;;  %v1869_v31 = vmul.f32 %v2728_v42, %v3577_v60  ;;  %v4210_v17 = vld [vmem:[#allocation36_spill] sm:$0xff] }
 0x213   : > { %v1757_v25 = vadd.f32 %v1749_v50, %v1727_v13  ;;  %v1720_v15 = vmul.f32 %v3558_v11, %v3916_v41  ;;  %v1721_v9 = vmul.f32 %v3558_v11, %v3994_v36  ;;  %v1928_v14 = vmul.f32 %v4208_v28, %v3840_v33  ;;  %v4209_v41 = vld [vmem:[#allocation35_spill] sm:$0xff] }
 0x214   : > { %v1846_v32 = vadd.f32 %v1838_v58, %v1816_v34  ;;  %v1638_v63 = vadd.f32 %v1630_v62, %v1608_v30  ;;  %v1639_v5 = vadd.f32 %v1631_v51, %v1609_v7  ;;  %v1899_v54 = vmul.f32 %v2729_v18, %v3657_v47  ;;  %v2731_v34 = vld [vmem:[#allocation2 + $0x26] sm:$0xff]  ;;  %v1829_v58 = vld [vmem:[#allocation2 + $0x32] sm:$0xff] }
 0x215   : > { %v1787_v37 = vadd.f32 %v3653_v57, %v1757_v25  ;;  %v1750_v55 = vmul.f32 %v3569_v44, %v3926_v6  ;;  %v1751_v16 = vmul.f32 %v3569_v44, %v1739_v48  ;;  %v1958_v61 = vmul.f32 %v4209_v41, %v3852_v46  ;;  %v1949_v48 = vld [vmem:[#allocation2 + $0x36] sm:$0xff] }
 0x216   : > { %v1876_v8 = vadd.f32 %v1868_v24, %v1846_v32  ;;  %v1668_v52 = vadd.f32 %v1660_v20, %v1638_v63  ;;  %v1669_v49 = vadd.f32 %v1661_v22, %v1639_v5  ;;  %v1929_v33 = vmul.f32 %v2730_v53, %v4208_v28  ;;  %v1859_v32 = vld [vmem:[#allocation2 + $0x33] sm:$0xff] }
 0x217   : > { %v1817_v56 = vadd.f32 %v1809_v12, %v1787_v37  ;;  %v1959_v6 = vmul.f32 %v2731_v34, %v4209_v41  ;;  %v1810_v44 = vmul.f32 %v3528_v2, %v3944_v23  ;;  %v1811_v12 = vmul.f32 %v3528_v2, %v1799_v4  ;;  %v952_v4 = vpop.f32.mrb[0].mxu1 }
 0x218   : > { %v1906_v45 = vadd.f32 %v1898_v27, %v1876_v8  ;;  %v1698_v11 = vadd.f32 %v1690_v21, %v1668_v52  ;;  %v1699_v26 = vadd.f32 %v1691_v38, %v1669_v49  ;;  %v1840_v22 = vmul.f32 %v3573_v43, %v3952_v59  ;;  %v1919_v8 = vld [vmem:[#allocation2 + $0x35] sm:$0xff] }
 0x219   : > { %v1847_v3 = vadd.f32 %v1839_v1, %v1817_v56  ;;  %v1841_v37 = vmul.f32 %v3573_v43, %v1829_v58  ;;  %v1870_v40 = vmul.f32 %v3577_v60, %v3962_v19  ;;  %v1889_v1 = vld [vmem:[#allocation2 + $0x34] sm:$0xff]  ;;  %v1871_v38 = vmul.f32 %v3577_v60, %v1859_v32  ;;  %v641_v58 = vpop.f32.mrb[8].mxu0 }
 0x21a   : > { %v1936_v35 = vadd.f32 %v1928_v14, %v1906_v45  ;;  %v1728_v50 = vadd.f32 %v1720_v15, %v1698_v11  ;;  %v1729_v62 = vadd.f32 %v1721_v9, %v1699_v26  ;;  %v1901_v43 = vmul.f32 %v3657_v47, %v1889_v1 }
 0x21b   : > { %v1877_v0 = vadd.f32 %v1869_v31, %v1847_v3  ;;  %v1930_v42 = vmul.f32 %v4208_v28, %v3984_v39  ;;  %v1931_v31 = vmul.f32 %v4208_v28, %v1919_v8  ;;  %v1960_v9 = vmul.f32 %v4209_v41, %v3994_v36 }
 0x21c   : > { %v1966_v13 = vadd.f32 %v1958_v61, %v1936_v35  ;;  %v1758_v29 = vadd.f32 %v1750_v55, %v1728_v50  ;;  %v1759_v25 = vadd.f32 %v1751_v16, %v1729_v62  ;;  %v1961_v45 = vmul.f32 %v4209_v41, %v1949_v48  ;;  %v954_v50 = vpop.f32.mrb[1].mxu1 }
 0x21d   : > { %v1907_v51 = vadd.f32 %v1899_v54, %v1877_v0  ;;  %v956_v34 = vpop.f32.mrb[2].mxu1 }
 0x21e   : > { %v1980_v46 = vadd.f32 %v4210_v17, %v1966_v13  ;;  %v1788_v30 = vadd.f32 %v3653_v57, %v1758_v29  ;;  %v1789_v7 = vadd.f32 %v3653_v57, %v1759_v25  ;;  %v1900_v57 = vmul.f32 %v3657_v47, %v3974_v10 }
 0x21f   : > { %v1937_v20 = vadd.f32 %v1929_v33, %v1907_v51 }
 0x220   : > { %v2462_v24 = vmul.f32 -1.442695, %v1980_v46  ;;  %v1818_v21 = vadd.f32 %v1810_v44, %v1788_v30  ;;  %v1819_v2 = vadd.f32 %v1811_v12, %v1789_v7  ;;  %v958_v44 = vpop.f32.mrb[3].mxu1 }
 0x221   : > { %v1967_v23 = vadd.f32 %v1959_v6, %v1937_v20 }
 0x222   : > { %2711 = vpow2.f32 %v2462_v24  ;;  %v1848_v27 = vadd.f32 %v1840_v22, %v1818_v21  ;;  %v1849_v63 = vadd.f32 %v1841_v37, %v1819_v2 }
 0x223   : > { %v1981_v59 = vadd.f32 %v4210_v17, %v1967_v23  ;;  %v2470_v23 = vld [vmem:[%s4109_s7] ss:$0 sm:$0xff] }
 0x224   : > { %v1878_v56 = vadd.f32 %v1870_v40, %v1848_v27  ;;  %v1879_v19 = vadd.f32 %v1871_v38, %v1849_v63 }
 0x225   : > { %v2463_v5 = vmul.f32 -1.442695, %v1981_v59 }
 0x226   : > { %v1908_v60 = vadd.f32 %v1900_v57, %v1878_v56  ;;  %v1909_v15 = vadd.f32 %v1901_v43, %v1879_v19 }
 0x227   : > { %2713 = vpow2.f32 %v2463_v5 }
 0x228   : > { %v1938_v10 = vadd.f32 %v1930_v42, %v1908_v60  ;;  %v1939_v14 = vadd.f32 %v1931_v31, %v1909_v15 }
 0x22a   : > { %v1968_v52 = vadd.f32 %v1960_v9, %v1938_v10  ;;  %v1969_v49 = vadd.f32 %v1961_v45, %v1939_v14 }
 0x22c   : > { %v2712_v47 = vpop.eup %2711  ;;  %v1982_v18 = vadd.f32 %v4210_v17, %v1968_v52  ;;  %v1983_v39 = vadd.f32 %v4210_v17, %v1969_v49  ;;  %v643_v17 = vpop.f32.mrb[9].mxu0 }
 0x22d   : > { %v2012_v3 = vadd.f32 1.0, %v2712_v47  ;;  %v645_v25 = vpop.f32.mrb[10].mxu0 }
 0x22e   : > { %v2464_v54 = vmul.f32 -1.442695, %v1982_v18  ;;  %v2465_v28 = vmul.f32 -1.442695, %v1983_v39  ;;  %v647_v12 = vpop.f32.mrb[11].mxu0 }
 0x22f   : > { %2715 = vrcp.f32 %v2012_v3  ;;  %v651_v32 = vpop.f32.mrb[12].mxu0 }
 0x230   : > { %2717 = vpow2.f32 %v2464_v54  ;;  %v653_v30 = vpop.f32.mrb[13].mxu0 }
 0x231   : > { %v2714_v55 = vpop.eup %2713  ;;  %2719 = vpow2.f32 %v2465_v28  ;;  %v655_v7 = vpop.f32.mrb[14].mxu0 }
 0x232   : > { %v2013_v16 = vadd.f32 1.0, %v2714_v55  ;;  %v657_v37 = vpop.f32.mrb[15].mxu0 }
 0x234   : > { %2721 = vrcp.f32 %v2013_v16 }
 0x239   : > { %v2716_v36 = vpop.eup %2715 }
 0x23a   : > { %v2718_v35 = vpop.eup %2717  ;;  %v2036_v0 = vmul.f32 %v2716_v36, %v1980_v46  ;;  %v962_v46 = vpop.f32.mrb[4].mxu1 }
 0x23b   : > { %v2720_v41 = vpop.eup %2719  ;;  %v2014_v61 = vadd.f32 1.0, %v2718_v35  ;;  %v964_v20 = vpop.f32.mrb[5].mxu1 }
 0x23c   : > { %v2015_v26 = vadd.f32 1.0, %v2720_v41  ;;  %v966_v22 = vpop.f32.mrb[6].mxu1 }
 0x23d   : > { %2723 = vrcp.f32 %v2014_v61  ;;  %v968_v24 = vpop.f32.mrb[7].mxu1 }
 0x23e   : > { %v2722_v11 = vpop.eup %2721  ;;  %2725 = vrcp.f32 %v2015_v26 }
 0x23f   : > { %v2037_v53 = vmul.f32 %v2722_v11, %v1981_v59 }
 0x241   : > { %v2044_v33 = vpack.c.bf16 %v2037_v53, %v2036_v0 }
 0x243   : > { %2515 = vmatprep.mubr.bf16.mxu0 %v2044_v33 }
 0x247   : > { %v2724_v13 = vpop.eup %2723 }
 0x248   : > { %v2726_v62 = vpop.eup %2725  ;;  %v2038_v51 = vmul.f32 %v2724_v13, %v1982_v18 }
 0x249   : > { %v2039_v6 = vmul.f32 %v2726_v62, %v1983_v39 }
 0x24b   : > { %v2045_v29 = vpack.c.bf16 %v2039_v6, %v2038_v51 }
 0x24d   : > { %2516 = vmatmul.mubr.bf16.vlgmr.msra.gmra.mrb[16].mxu0 %v2045_v29 }
 0x2ae   : > { %v2521_v40 = vpop.f32.mrb[8].mxu1 }
 0x2af   : > { %v2177_v1 = vadd.f32 %v2521_v40, %v2470_v23  ;;  %v2168_v21 = vpop.f32.mrb[9].mxu1 }
 0x2b0   : > { %v2169_v2 = vadd.f32 %v2470_v23, %v2168_v21  ;;  %v2522_v38 = vpop.f32.mrb[10].mxu1 }
 0x2b1   : > { %2189 = vst [vmem:[%s434_s18 + $0x30] sm:$0xff] %v2177_v1  ;;  %v2180_v59 = vadd.f32 %v2522_v38, %v2470_v23  ;;  %v2171_v8 = vpop.f32.mrb[11].mxu1 }
 0x2b2   : > { %2187 = vst [vmem:[%s434_s18 + $0x20] sm:$0xff] %v2169_v2  ;;  %v2172_v27 = vadd.f32 %v2470_v23, %v2171_v8 }
 0x2b3   : > { %2190 = vst [vmem:[%s434_s18 + $0x38] sm:$0xff] %v2180_v59 }
 0x2b4   : > { %2188 = vst [vmem:[%s434_s18 + $0x28] sm:$0xff] %v2172_v27 }
 0x320   : > { %v2517_v63 = vpop.f32.mrb[16].mxu0 }
 0x321   : > { %v2161_v57 = vadd.f32 %v2517_v63, %v2470_v23  ;;  %v2152_v43 = vpop.f32.mrb[17].mxu0 }
 0x322   : > { %v2153_v5 = vadd.f32 %v2470_v23, %v2152_v43  ;;  %v2518_v48 = vpop.f32.mrb[18].mxu0 }
 0x323   : > { %2185 = vst [vmem:[%s434_s18 + $0x10] sm:$0xff] %v2161_v57  ;;  %v2164_v56 = vadd.f32 %v2518_v48, %v2470_v23  ;;  %v2155_v19 = vpop.f32.mrb[19].mxu0 }
 0x324   : > { %2183 = vst [vmem:[%s434_s18] sm:$0xff] %v2153_v5  ;;  %v2156_v42 = vadd.f32 %v2470_v23, %v2155_v19 }
 0x325   : > { %2186 = vst [vmem:[%s434_s18 + $0x18] sm:$0xff] %v2164_v56 }
 0x326   : > { %2184 = vst [vmem:[%s434_s18 + $0x8] sm:$0xff] %v2156_v42 }
 0x327   : > { %2890 = shalt.err (!%p2887_p11)
}
 0x328   : > { %s2891_s13 = scalar_lea.hbm %s4053_s4, 1024  ;;  %s2895_s14 = scalar_lea.hbm %s4212_s26, 2048 }
 0x329   : > { %p2892_p12 = scmp.ne.s32.totalorder %s4053_s4, %s2891_s13  ;;  %p2896_p9 = scmp.lt.u32.totalorder %s4053_s4, %s4212_s26 }
 0x32a   : > { %p2897_p0 = scmp.lt.u32.totalorder %s2895_s14, %s2891_s13  ;;  %p2899_p4 = scmp.lt.u32.totalorder %s2891_s13, %s4053_s4 }
 0x32b   : > { %p2893_p6 = pnand %p2892_p12, %p3182_p10 }
 0x32c   : > { %p2898_p1 = por %p2897_p0, %p2896_p9 }
 0x32d   : > { %p2894_p7 = pneg %p2893_p6 }
 0x32e   : > { %p2900_p8 = por %p2899_p4, %p2898_p1 }
 0x330   : > { %p2901_p2 = pnand %p2900_p8, %p2894_p7 }
 0x332   : > { %2904 = shalt.err (!%p2901_p2)
}
 0x333   : > { %s2985_s24 = smov 128   ;;  %s2986_s18 = smov 8  }
 0x334   : > { %2555 = dma.vmem_to_hbm [thread:$0]  (%p3182_p10), %s4048_s19, 1024, %s4053_s4, %s2192_s15, %s2985_s24, %s2985_s24, %s2986_s18  }
 0x335 PF: > { %s4213_s21 = sld [smem:[#allocation18_spill]]  ;;  %s4214_s0 = sld [smem:[#allocation20_spill]] }
 0x336   : > { %p4216_p3 = scmp.ge.s32.totalorder %s2971_s10, 2 }
 0x33b   : > { %s2222_s8 = sand.u32 1, %s4213_s21   ;;  %p4215_p13 = scmp.ne.s32.totalorder %s4214_s0, 0 }
 0x33c   : > { %s2223_s25 = scalar_lea.sflag [#allocation5], %s2222_s8 }
 0x33d   : > { %p2575_p5 = pnand %p4216_p3, %p4215_p13 }
 0x33f   : > { %2946 = dma.done.wait (!%p2575_p5), %s2223_s25, 1024  }
 0x340   : > { %2948 = vsyncadd (!%p2575_p5), %s2223_s25, 4294966272  ;;  %s28_s10 = sadd.s32 1, %s2971_s10   ;;  %s4217_s6 = smov %s4224_s27 }
 0x341   : > { %p25_p11 = scmp.ge.s32.totalorder %s28_s10, 4   ;;  %s4218_s27 = smov %s2955_s28 }
 0x342   : > { %s4219_s28 = smov %s2959_s29  ;;  %s4220_s29 = smov %s3197_s12 }
 0x343   : > { %s4221_s30 = smov %s2967_s9  ;;  %s4222_s9 = smov %s4217_s6 }
 0x344   :  { %27 = sbr.rel (!%p25_p11) target bundleno = 15 (0xf), region = 168 }
 0x34b   :  { %2228 = vsyncpa [#allocation4], 1 }
 0x34c   :  { %2230 = vsyncpa [#allocation4 + $0x1], 1 }
 0x34d   :  { %2231 = vsyncpa [#allocation7], 1 }
 0x34e   :  { %2233 = vsyncpa [#allocation7 + $0x1], 1 }
 0x34f   :  { %2234 = vsyncpa [#allocation10], 1 }
 0x350   :  { %2235 = vsyncpa [#allocation5], 1 }
 0x351   :  { %2237 = vsyncpa [#allocation5 + $0x1], 1 }

</bundles_post_ra>
